<compile_context>
chip_gen: v7x
topology: tpu7x:2x2x1
jax: 0.10.0
libtpu: 0.0.40
codegen_flags: <defaults>
</compile_context>

<pallas_src>
import functools
import math

import jax
import jax.numpy as jnp
from jax.experimental import pallas as pl
from jax.experimental.pallas import tpu as pltpu

EPS = 1e-6
COMPUTE_DTYPE = jnp.bfloat16  # matmul-input dtype; accumulation is always f32


# ----------------------------- Pallas kernels ------------------------------

def _layernorm_f32(x, g, b):
    # Biased variance, eps inside sqrt — matches torch.nn.LayerNorm. All f32.
    mean = jnp.mean(x, axis=-1, keepdims=True)
    var = jnp.mean(jnp.square(x - mean), axis=-1, keepdims=True)
    return (x - mean) * jax.lax.rsqrt(var + EPS) * g + b


def _ln_qkv_kernel(x_ref, g_ref, b_ref, w_ref, bias_ref, o_ref):
    """Fused LayerNorm -> QKV projection for one row-tile."""
    x = x_ref[...].astype(jnp.float32)
    h = _layernorm_f32(x, g_ref[...].astype(jnp.float32),
                       b_ref[...].astype(jnp.float32))
    y = jnp.dot(h.astype(w_ref.dtype), w_ref[...],
                preferred_element_type=jnp.float32)
    y = y + bias_ref[...].astype(jnp.float32)
    o_ref[...] = y.astype(o_ref.dtype)


def _attn_outproj_kernel(qkv_ref, x_ref, wo_ref, bo_ref, o_ref, *,
                         num_heads, scale):
    """Fused MHA + output projection + residual add for one batch element.

    qkv_ref: (N, 3D) bf16; x_ref: (N, D) f32 residual stream;
    wo_ref: (D, D) bf16 in (K, O) layout; bo_ref: (1, D) f32.
    """
    D = x_ref.shape[-1]
    dh = D // num_heads
    qkv = qkv_ref[...]           # (N, 3D) bf16, loaded once
    wo = wo_ref[...]             # (D, D) bf16
    acc = x_ref[...].astype(jnp.float32) + bo_ref[...].astype(jnp.float32)
    # Static per-head unroll; head split/merge and out-proj fold stay in-kernel.
    # TODO(synk): lane-dense head batching + flash tiling for large N / dh.
    for h in range(num_heads):
        q = qkv[:, h * dh:(h + 1) * dh]                 # (N, dh) bf16
        k = qkv[:, D + h * dh:D + (h + 1) * dh]
        v = qkv[:, 2 * D + h * dh:2 * D + (h + 1) * dh]
        # scores: contract last dims (no explicit transpose), f32 accumulate
        s = jax.lax.dot_general(q, k, (((1,), (1,)), ((), ())),
                                preferred_element_type=jnp.float32) * scale
        m = jnp.max(s, axis=-1, keepdims=True)
        p = jnp.exp(s - m)
        p = p * pl.reciprocal(jnp.sum(p, axis=-1, keepdims=True), approx=True)
        o_h = jnp.dot(p.astype(v.dtype), v,
                      preferred_element_type=jnp.float32)          # (N, dh)
        w_h = wo[h * dh:(h + 1) * dh, :]                            # (dh, D)
        acc = acc + jnp.dot(o_h.astype(w_h.dtype), w_h,
                            preferred_element_type=jnp.float32)
    o_ref[...] = acc.astype(o_ref.dtype)


def _ln_mlp_residual_kernel(x_ref, g_ref, b_ref, w1_ref, b1_ref,
                            w2_ref, b2_ref, o_ref):
    """Fused LayerNorm -> Linear -> GELU -> Linear -> residual add."""
    x = x_ref[...].astype(jnp.float32)
    h = _layernorm_f32(x, g_ref[...].astype(jnp.float32),
                       b_ref[...].astype(jnp.float32))
    t = jnp.dot(h.astype(w1_ref.dtype), w1_ref[...],
                preferred_element_type=jnp.float32)
    t = t + b1_ref[...].astype(jnp.float32)
    # exact erf GELU (torch.nn.GELU default)
    t = 0.5 * t * (1.0 + jax.lax.erf(t * (1.0 / math.sqrt(2.0))))
    y = jnp.dot(t.astype(w2_ref.dtype), w2_ref[...],
                preferred_element_type=jnp.float32)
    y = y + b2_ref[...].astype(jnp.float32)
    o_ref[...] = (x + y).astype(o_ref.dtype)


def _final_ln_kernel(x_ref, g_ref, b_ref, o_ref):
    x = x_ref[...].astype(jnp.float32)
    o_ref[...] = _layernorm_f32(x, g_ref[...].astype(jnp.float32),
                                b_ref[...].astype(jnp.float32)).astype(o_ref.dtype)


# ----------------------------- pallas_call wrappers -------------------------

def _parallel():
    return pltpu.CompilerParams(dimension_semantics=("parallel",))


def ln_qkv(x2d, g, b, w_qkv, b_qkv, *, tm):
    M, D = x2d.shape
    O = w_qkv.shape[1]
    return pl.pallas_call(
        _ln_qkv_kernel,
        out_shape=jax.ShapeDtypeStruct((M, O), COMPUTE_DTYPE),
        grid=(pl.cdiv(M, tm),),
        in_specs=[
            pl.BlockSpec((tm, D), lambda i: (i, 0)),
            pl.BlockSpec((1, D), lambda i: (0, 0)),
            pl.BlockSpec((1, D), lambda i: (0, 0)),
            pl.BlockSpec((D, O), lambda i: (0, 0)),   # weight stays VMEM-resident
            pl.BlockSpec((1, O), lambda i: (0, 0)),
        ],
        out_specs=pl.BlockSpec((tm, O), lambda i: (i, 0)),
        compiler_params=_parallel(),
    )(x2d, g, b, w_qkv, b_qkv)


def attn_outproj(qkv2d, x2d, w_out, b_out, *, batch, num_heads):
    M, D = x2d.shape
    N = M // batch
    kernel = functools.partial(_attn_outproj_kernel, num_heads=num_heads,
                               scale=1.0 / math.sqrt(D // num_heads))
    return pl.pallas_call(
        kernel,
        out_shape=jax.ShapeDtypeStruct((M, D), x2d.dtype),
        grid=(batch,),
        in_specs=[
            pl.BlockSpec((N, 3 * D), lambda bidx: (bidx, 0)),
            pl.BlockSpec((N, D), lambda bidx: (bidx, 0)),
            pl.BlockSpec((D, D), lambda bidx: (0, 0)),
            pl.BlockSpec((1, D), lambda bidx: (0, 0)),
        ],
        out_specs=pl.BlockSpec((N, D), lambda bidx: (bidx, 0)),
        compiler_params=_parallel(),
    )(qkv2d, x2d, w_out, b_out)


def ln_mlp_residual(x2d, g, b, w1, b1, w2, b2, *, tm):
    M, D = x2d.shape
    Hd = w1.shape[1]
    return pl.pallas_call(
        _ln_mlp_residual_kernel,
        out_shape=jax.ShapeDtypeStruct((M, D), x2d.dtype),
        grid=(pl.cdiv(M, tm),),
        in_specs=[
            pl.BlockSpec((tm, D), lambda i: (i, 0)),
            pl.BlockSpec((1, D), lambda i: (0, 0)),
            pl.BlockSpec((1, D), lambda i: (0, 0)),
            pl.BlockSpec((D, Hd), lambda i: (0, 0)),
            pl.BlockSpec((1, Hd), lambda i: (0, 0)),
            pl.BlockSpec((Hd, D), lambda i: (0, 0)),
            pl.BlockSpec((1, D), lambda i: (0, 0)),
        ],
        out_specs=pl.BlockSpec((tm, D), lambda i: (i, 0)),
        compiler_params=_parallel(),
    )(x2d, g, b, w1, b1, w2, b2)


def final_layernorm(x2d, g, b, *, tm):
    M, D = x2d.shape
    return pl.pallas_call(
        _final_ln_kernel,
        out_shape=jax.ShapeDtypeStruct((M, D), x2d.dtype),
        grid=(pl.cdiv(M, tm),),
        in_specs=[
            pl.BlockSpec((tm, D), lambda i: (i, 0)),
            pl.BlockSpec((1, D), lambda i: (0, 0)),
            pl.BlockSpec((1, D), lambda i: (0, 0)),
        ],
        out_specs=pl.BlockSpec((tm, D), lambda i: (i, 0)),
        compiler_params=_parallel(),
    )(x2d, g, b)


# ----------------------------- model (glue) --------------------------------

def basic_block(x2d, p, *, batch, num_heads, tm):
    # x = x + MHA(LN1(x));  x = x + MLP(LN2(x))
    qkv = ln_qkv(x2d, p["ln1_g"], p["ln1_b"], p["w_qkv"], p["b_qkv"], tm=tm)
    x2d = attn_outproj(qkv, x2d, p["w_out"], p["b_out"],
                       batch=batch, num_heads=num_heads)
    x2d = ln_mlp_residual(x2d, p["ln2_g"], p["ln2_b"],
                          p["w_fc1"], p["b_fc1"], p["w_fc2"], p["b_fc2"], tm=tm)
    return x2d


def transformer_decoder_forward(x, params, *, num_heads):
    # block_type='basic': for layer in layers: x = layer(x); x = self.norm(x)
    B, N, D = x.shape
    M = B * N
    tm = M if M <= 256 else 256          # row tile (multiple of 8 or == M)
    x2d = x.reshape(M, D)
    for layer_p in params["layers"]:
        x2d = basic_block(x2d, layer_p, batch=B, num_heads=num_heads, tm=tm)
    x2d = final_layernorm(x2d, params["norm_g"], params["norm_b"], tm=tm)
    return x2d.reshape(B, N, D)


# ----------------------------- params --------------------------------------

def init_params(key, num_layers, inner_dim, mlp_hidden):
    """Torch-layout f32 params (Linear weight is (out, in))."""
    D, Hd = inner_dim, mlp_hidden

    def dense(k, shape, scale=0.02):
        return scale * jax.random.normal(k, shape, jnp.float32)

    keys = iter(jax.random.split(key, num_layers * 8 + 1))
    layers = []
    for _ in range(num_layers):
        layers.append({
            "ln1_g": jnp.ones((D,), jnp.float32),
            "ln1_b": jnp.zeros((D,), jnp.float32),
            "w_qkv": dense(next(keys), (3 * D, D)),   # torch in_proj_weight layout
            "b_qkv": dense(next(keys), (3 * D,)),
            "w_out": dense(next(keys), (D, D)),
            "b_out": dense(next(keys), (D,)),
            "ln2_g": jnp.ones((D,), jnp.float32),
            "ln2_b": jnp.zeros((D,), jnp.float32),
            "w_fc1": dense(next(keys), (Hd, D)),
            "b_fc1": dense(next(keys), (Hd,)),
            "w_fc2": dense(next(keys), (D, Hd)),
            "b_fc2": dense(next(keys), (D,)),
        })
    return {
        "layers": layers,
        "norm_g": jnp.ones((D,), jnp.float32),
        "norm_b": jnp.zeros((D,), jnp.float32),
    }


def prepare_params(raw):
    """One-time layout prep: weights -> (K, O) bf16; LN params / biases -> (1, X) f32."""
    def w(t):
        return jnp.asarray(t.T, COMPUTE_DTYPE)

    def vec(t):
        return jnp.asarray(t, jnp.float32).reshape(1, -1)

    layers = []
    for lp in raw["layers"]:
        layers.append({
            "ln1_g": vec(lp["ln1_g"]), "ln1_b": vec(lp["ln1_b"]),
            "w_qkv": w(lp["w_qkv"]), "b_qkv": vec(lp["b_qkv"]),
            "w_out": w(lp["w_out"]), "b_out": vec(lp["b_out"]),
            "ln2_g": vec(lp["ln2_g"]), "ln2_b": vec(lp["ln2_b"]),
            "w_fc1": w(lp["w_fc1"]), "b_fc1": vec(lp["b_fc1"]),
            "w_fc2": w(lp["w_fc2"]), "b_fc2": vec(lp["b_fc2"]),
        })
    return {"layers": layers, "norm_g": vec(raw["norm_g"]),
            "norm_b": vec(raw["norm_b"])}


# ----------------------------- pure-JAX reference ---------------------------

def reference_forward(x, raw, num_heads):
    def ln(t, g, b):
        mu = jnp.mean(t, -1, keepdims=True)
        var = jnp.mean((t - mu) ** 2, -1, keepdims=True)
        return (t - mu) * jax.lax.rsqrt(var + EPS) * g + b

    B, N, D = x.shape
    H = num_heads
    dh = D // H
    for p in raw["layers"]:
        h = ln(x, p["ln1_g"], p["ln1_b"])
        qkv = h @ p["w_qkv"].T + p["b_qkv"]
        q, k, v = jnp.split(qkv, 3, axis=-1)

        def heads(t):
            return t.reshape(B, N, H, dh).transpose(0, 2, 1, 3)

        q, k, v = heads(q), heads(k), heads(v)
        s = jnp.einsum("bhqd,bhkd->bhqk", q, k) / math.sqrt(dh)
        a = jax.nn.softmax(s, axis=-1)
        o = jnp.einsum("bhqk,bhkd->bhqd", a, v).transpose(0, 2, 1, 3).reshape(B, N, D)
        x = x + o @ p["w_out"].T + p["b_out"]
        h2 = ln(x, p["ln2_g"], p["ln2_b"])
        m = h2 @ p["w_fc1"].T + p["b_fc1"]
        m = 0.5 * m * (1.0 + jax.lax.erf(m / math.sqrt(2.0)))
        x = x + m @ p["w_fc2"].T + p["b_fc2"]
    return ln(x, raw["norm_g"], raw["norm_b"])


# ----------------------------- main -----------------------------------------

if __name__ == "__main__":
    # Small shapes consistent with TransformerDecoder('basic', ...):
    B, N = 2, 8              # batch, sequence length
    inner_dim = 32           # model dim
    num_heads = 4            # head dim = 8
    num_layers = 2
    mlp_hidden = 4 * inner_dim

    root = jax.random.PRNGKey(0)
    k_x, k_p = jax.random.split(root)
    x = jax.random.normal(k_x, (B, N, inner_dim), jnp.float32)
    raw_params = init_params(k_p, num_layers, inner_dim, mlp_hidden)
    params = prepare_params(raw_params)

    fwd = jax.jit(functools.partial(transformer_decoder_forward,
                                    num_heads=num_heads))
    y = jax.block_until_ready(fwd(x, params))

    assert y.shape == (B, N, inner_dim), y.shape
    assert bool(jnp.all(jnp.isfinite(y))), "non-finite output"

    # Numerical sanity vs f32 pure-JAX reference (bf16 matmul inputs => loose tol)
    y_ref = reference_forward(x, raw_params, num_heads)
    assert bool(jnp.allclose(y, y_ref, atol=2e-2, rtol=2e-2)), (
        float(jnp.max(jnp.abs(y - y_ref))))

    print("KERNEL_OK")
</pallas_src>

<mosaic_0001>
module attributes {stable_mosaic.version = 11 : i64} {
  func.func @_ln_qkv_kernel(%arg0: i32, %arg1: memref<16x32xf32, #tpu.memory_space<vmem>>, %arg2: memref<1x32xf32, #tpu.memory_space<vmem>>, %arg3: memref<1x32xf32, #tpu.memory_space<vmem>>, %arg4: memref<32x96xbf16, #tpu.memory_space<vmem>>, %arg5: memref<1x96xf32, #tpu.memory_space<vmem>>, %arg6: memref<16x96xbf16, #tpu.memory_space<vmem>>) attributes {dimension_semantics = [#tpu.dimension_semantics<parallel>], iteration_bounds = array<i64: 1>, scalar_prefetch = 0 : i64, scratch_operands = 0 : i64, tpu.core_type = #tpu.core_type<tc>, window_params = [{transform_indices = @transform_0, window_bounds = array<i64: 16, 32>}, {pipeline_mode = #tpu.pipeline_mode<synchronous>, transform_indices = @transform_1, window_bounds = array<i64: 1, 32>}, {pipeline_mode = #tpu.pipeline_mode<synchronous>, transform_indices = @transform_2, window_bounds = array<i64: 1, 32>}, {pipeline_mode = #tpu.pipeline_mode<synchronous>, transform_indices = @transform_3, window_bounds = array<i64: 32, 96>}, {pipeline_mode = #tpu.pipeline_mode<synchronous>, transform_indices = @transform_4, window_bounds = array<i64: 1, 96>}, {transform_indices = @transform_5, window_bounds = array<i64: 16, 96>}]} {
    %c0 = arith.constant 0 : index
    %c0_0 = arith.constant 0 : index
    %0 = vector.load %arg1[%c0, %c0_0] : memref<16x32xf32, #tpu.memory_space<vmem>>, vector<16x32xf32>
    %c0_1 = arith.constant 0 : index
    %c0_2 = arith.constant 0 : index
    %1 = vector.load %arg2[%c0_1, %c0_2] : memref<1x32xf32, #tpu.memory_space<vmem>>, vector<1x32xf32>
    %c0_3 = arith.constant 0 : index
    %c0_4 = arith.constant 0 : index
    %2 = vector.load %arg3[%c0_3, %c0_4] : memref<1x32xf32, #tpu.memory_space<vmem>>, vector<1x32xf32>
    %cst = arith.constant dense<0.000000e+00> : vector<16xf32>
    %3 = vector.multi_reduction <add>, %0, %cst [1] : vector<16x32xf32> to vector<16xf32>
    %4 = vector.shape_cast %3 : vector<16xf32> to vector<16x1xf32>
    %cst_5 = arith.constant 3.200000e+01 : f32
    %5 = vector.broadcast %cst_5 : f32 to vector<16x1xf32>
    %6 = arith.divf %4, %5 : vector<16x1xf32>
    %7 = vector.broadcast %6 : vector<16x1xf32> to vector<16x32xf32>
    %8 = arith.subf %0, %7 : vector<16x32xf32>
    %9 = arith.mulf %8, %8 : vector<16x32xf32>
    %cst_6 = arith.constant dense<0.000000e+00> : vector<16xf32>
    %10 = vector.multi_reduction <add>, %9, %cst_6 [1] : vector<16x32xf32> to vector<16xf32>
    %11 = vector.shape_cast %10 : vector<16xf32> to vector<16x1xf32>
    %cst_7 = arith.constant 3.200000e+01 : f32
    %12 = vector.broadcast %cst_7 : f32 to vector<16x1xf32>
    %13 = arith.divf %11, %12 : vector<16x1xf32>
    %14 = vector.broadcast %6 : vector<16x1xf32> to vector<16x32xf32>
    %15 = arith.subf %0, %14 : vector<16x32xf32>
    %cst_8 = arith.constant 9.99999997E-7 : f32
    %16 = vector.broadcast %cst_8 : f32 to vector<16x1xf32>
    %17 = arith.addf %13, %16 : vector<16x1xf32>
    %18 = math.rsqrt %17 : vector<16x1xf32>
    %19 = vector.broadcast %18 : vector<16x1xf32> to vector<16x32xf32>
    %20 = arith.mulf %15, %19 : vector<16x32xf32>
    %21 = vector.broadcast %1 : vector<1x32xf32> to vector<16x32xf32>
    %22 = arith.mulf %20, %21 : vector<16x32xf32>
    %23 = vector.broadcast %2 : vector<1x32xf32> to vector<16x32xf32>
    %24 = arith.addf %22, %23 : vector<16x32xf32>
    %25 = arith.truncf %24 : vector<16x32xf32> to vector<16x32xbf16>
    %c0_9 = arith.constant 0 : index
    %c0_10 = arith.constant 0 : index
    %26 = vector.load %arg4[%c0_9, %c0_10] : memref<32x96xbf16, #tpu.memory_space<vmem>>, vector<32x96xbf16>
    %cst_11 = arith.constant dense<0.000000e+00> : vector<16x96xf32>
    %27 = tpu.matmul %25, %26, %cst_11 {dimension_numbers = #tpu.dot_dimension_numbers<[1], [0], [0], [1], [0, 0, 1, 1], [], []>} : vector<16x32xbf16>, vector<32x96xbf16>, vector<16x96xf32> -> vector<16x96xf32>
    %c0_12 = arith.constant 0 : index
    %c0_13 = arith.constant 0 : index
    %28 = vector.load %arg5[%c0_12, %c0_13] : memref<1x96xf32, #tpu.memory_space<vmem>>, vector<1x96xf32>
    %29 = vector.broadcast %28 : vector<1x96xf32> to vector<16x96xf32>
    %30 = arith.addf %27, %29 : vector<16x96xf32>
    %31 = arith.truncf %30 : vector<16x96xf32> to vector<16x96xbf16>
    %c0_14 = arith.constant 0 : index
    %c0_15 = arith.constant 0 : index
    %32 = vector.load %arg6[%c0_14, %c0_15] : memref<16x96xbf16, #tpu.memory_space<vmem>>, vector<16x96xbf16>
    tpu.vector_store %arg6[%c0_14, %c0_15], %31 {strides = array<i32>} : memref<16x96xbf16, #tpu.memory_space<vmem>>, vector<16x96xbf16>,
    return
  }
  func.func @transform_0(%arg0: i32) -> (i32, i32) {
    %c0_i32 = arith.constant 0 : i32
    %c0_i32_0 = arith.constant 0 : i32
    return %arg0, %c0_i32 : i32, i32
  }
  func.func @transform_1(%arg0: i32) -> (i32, i32) {
    %c0_i32 = arith.constant 0 : i32
    %c0_i32_0 = arith.constant 0 : i32
    %c0_i32_1 = arith.constant 0 : i32
    return %c0_i32, %c0_i32_0 : i32, i32
  }
  func.func @transform_2(%arg0: i32) -> (i32, i32) {
    %c0_i32 = arith.constant 0 : i32
    %c0_i32_0 = arith.constant 0 : i32
    %c0_i32_1 = arith.constant 0 : i32
    return %c0_i32, %c0_i32_0 : i32, i32
  }
  func.func @transform_3(%arg0: i32) -> (i32, i32) {
    %c0_i32 = arith.constant 0 : i32
    %c0_i32_0 = arith.constant 0 : i32
    %c0_i32_1 = arith.constant 0 : i32
    return %c0_i32, %c0_i32_0 : i32, i32
  }
  func.func @transform_4(%arg0: i32) -> (i32, i32) {
    %c0_i32 = arith.constant 0 : i32
    %c0_i32_0 = arith.constant 0 : i32
    %c0_i32_1 = arith.constant 0 : i32
    return %c0_i32, %c0_i32_0 : i32, i32
  }
  func.func @transform_5(%arg0: i32) -> (i32, i32) {
    %c0_i32 = arith.constant 0 : i32
    %c0_i32_0 = arith.constant 0 : i32
    return %arg0, %c0_i32 : i32, i32
  }
}

module attributes {stable_mosaic.version = 11 : i64} {
  func.func @_ln_mlp_residual_kernel(%arg0: i32, %arg1: memref<16x32xf32, #tpu.memory_space<vmem>>, %arg2: memref<1x32xf32, #tpu.memory_space<vmem>>, %arg3: memref<1x32xf32, #tpu.memory_space<vmem>>, %arg4: memref<32x128xbf16, #tpu.memory_space<vmem>>, %arg5: memref<1x128xf32, #tpu.memory_space<vmem>>, %arg6: memref<128x32xbf16, #tpu.memory_space<vmem>>, %arg7: memref<1x32xf32, #tpu.memory_space<vmem>>, %arg8: memref<16x32xf32, #tpu.memory_space<vmem>>) attributes {dimension_semantics = [#tpu.dimension_semantics<parallel>], iteration_bounds = array<i64: 1>, scalar_prefetch = 0 : i64, scratch_operands = 0 : i64, tpu.core_type = #tpu.core_type<tc>, window_params = [{transform_indices = @transform_0, window_bounds = array<i64: 16, 32>}, {pipeline_mode = #tpu.pipeline_mode<synchronous>, transform_indices = @transform_1, window_bounds = array<i64: 1, 32>}, {pipeline_mode = #tpu.pipeline_mode<synchronous>, transform_indices = @transform_2, window_bounds = array<i64: 1, 32>}, {pipeline_mode = #tpu.pipeline_mode<synchronous>, transform_indices = @transform_3, window_bounds = array<i64: 32, 128>}, {pipeline_mode = #tpu.pipeline_mode<synchronous>, transform_indices = @transform_4, window_bounds = array<i64: 1, 128>}, {pipeline_mode = #tpu.pipeline_mode<synchronous>, transform_indices = @transform_5, window_bounds = array<i64: 128, 32>}, {pipeline_mode = #tpu.pipeline_mode<synchronous>, transform_indices = @transform_6, window_bounds = array<i64: 1, 32>}, {transform_indices = @transform_7, window_bounds = array<i64: 16, 32>}]} {
    %c0 = arith.constant 0 : index
    %c0_0 = arith.constant 0 : index
    %0 = vector.load %arg1[%c0, %c0_0] : memref<16x32xf32, #tpu.memory_space<vmem>>, vector<16x32xf32>
    %c0_1 = arith.constant 0 : index
    %c0_2 = arith.constant 0 : index
    %1 = vector.load %arg2[%c0_1, %c0_2] : memref<1x32xf32, #tpu.memory_space<vmem>>, vector<1x32xf32>
    %c0_3 = arith.constant 0 : index
    %c0_4 = arith.constant 0 : index
    %2 = vector.load %arg3[%c0_3, %c0_4] : memref<1x32xf32, #tpu.memory_space<vmem>>, vector<1x32xf32>
    %cst = arith.constant dense<0.000000e+00> : vector<16xf32>
    %3 = vector.multi_reduction <add>, %0, %cst [1] : vector<16x32xf32> to vector<16xf32>
    %4 = vector.shape_cast %3 : vector<16xf32> to vector<16x1xf32>
    %cst_5 = arith.constant 3.200000e+01 : f32
    %5 = vector.broadcast %cst_5 : f32 to vector<16x1xf32>
    %6 = arith.divf %4, %5 : vector<16x1xf32>
    %7 = vector.broadcast %6 : vector<16x1xf32> to vector<16x32xf32>
    %8 = arith.subf %0, %7 : vector<16x32xf32>
    %9 = arith.mulf %8, %8 : vector<16x32xf32>
    %cst_6 = arith.constant dense<0.000000e+00> : vector<16xf32>
    %10 = vector.multi_reduction <add>, %9, %cst_6 [1] : vector<16x32xf32> to vector<16xf32>
    %11 = vector.shape_cast %10 : vector<16xf32> to vector<16x1xf32>
    %cst_7 = arith.constant 3.200000e+01 : f32
    %12 = vector.broadcast %cst_7 : f32 to vector<16x1xf32>
    %13 = arith.divf %11, %12 : vector<16x1xf32>
    %14 = vector.broadcast %6 : vector<16x1xf32> to vector<16x32xf32>
    %15 = arith.subf %0, %14 : vector<16x32xf32>
    %cst_8 = arith.constant 9.99999997E-7 : f32
    %16 = vector.broadcast %cst_8 : f32 to vector<16x1xf32>
    %17 = arith.addf %13, %16 : vector<16x1xf32>
    %18 = math.rsqrt %17 : vector<16x1xf32>
    %19 = vector.broadcast %18 : vector<16x1xf32> to vector<16x32xf32>
    %20 = arith.mulf %15, %19 : vector<16x32xf32>
    %21 = vector.broadcast %1 : vector<1x32xf32> to vector<16x32xf32>
    %22 = arith.mulf %20, %21 : vector<16x32xf32>
    %23 = vector.broadcast %2 : vector<1x32xf32> to vector<16x32xf32>
    %24 = arith.addf %22, %23 : vector<16x32xf32>
    %25 = arith.truncf %24 : vector<16x32xf32> to vector<16x32xbf16>
    %c0_9 = arith.constant 0 : index
    %c0_10 = arith.constant 0 : index
    %26 = vector.load %arg4[%c0_9, %c0_10] : memref<32x128xbf16, #tpu.memory_space<vmem>>, vector<32x128xbf16>
    %cst_11 = arith.constant dense<0.000000e+00> : vector<16x128xf32>
    %27 = tpu.matmul %25, %26, %cst_11 {dimension_numbers = #tpu.dot_dimension_numbers<[1], [0], [0], [1], [0, 0, 1, 1], [], []>} : vector<16x32xbf16>, vector<32x128xbf16>, vector<16x128xf32> -> vector<16x128xf32>
    %c0_12 = arith.constant 0 : index
    %c0_13 = arith.constant 0 : index
    %28 = vector.load %arg5[%c0_12, %c0_13] : memref<1x128xf32, #tpu.memory_space<vmem>>, vector<1x128xf32>
    %29 = vector.broadcast %28 : vector<1x128xf32> to vector<16x128xf32>
    %30 = arith.addf %27, %29 : vector<16x128xf32>
    %cst_14 = arith.constant 5.000000e-01 : f32
    %31 = vector.broadcast %cst_14 : f32 to vector<16x128xf32>
    %32 = arith.mulf %31, %30 : vector<16x128xf32>
    %cst_15 = arith.constant 0.707106769 : f32
    %33 = vector.broadcast %cst_15 : f32 to vector<16x128xf32>
    %34 = arith.mulf %30, %33 : vector<16x128xf32>
    %35 = math.erf %34 : vector<16x128xf32>
    %cst_16 = arith.constant 1.000000e+00 : f32
    %36 = vector.broadcast %cst_16 : f32 to vector<16x128xf32>
    %37 = arith.addf %36, %35 : vector<16x128xf32>
    %38 = arith.mulf %32, %37 : vector<16x128xf32>
    %39 = arith.truncf %38 : vector<16x128xf32> to vector<16x128xbf16>
    %c0_17 = arith.constant 0 : index
    %c0_18 = arith.constant 0 : index
    %40 = vector.load %arg6[%c0_17, %c0_18] : memref<128x32xbf16, #tpu.memory_space<vmem>>, vector<128x32xbf16>
    %cst_19 = arith.constant dense<0.000000e+00> : vector<16x32xf32>
    %41 = tpu.matmul %39, %40, %cst_19 {dimension_numbers = #tpu.dot_dimension_numbers<[1], [0], [0], [1], [0, 0, 1, 1], [], []>} : vector<16x128xbf16>, vector<128x32xbf16>, vector<16x32xf32> -> vector<16x32xf32>
    %c0_20 = arith.constant 0 : index
    %c0_21 = arith.constant 0 : index
    %42 = vector.load %arg7[%c0_20, %c0_21] : memref<1x32xf32, #tpu.memory_space<vmem>>, vector<1x32xf32>
    %43 = vector.broadcast %42 : vector<1x32xf32> to vector<16x32xf32>
    %44 = arith.addf %41, %43 : vector<16x32xf32>
    %45 = arith.addf %0, %44 : vector<16x32xf32>
    %c0_22 = arith.constant 0 : index
    %c0_23 = arith.constant 0 : index
    %46 = vector.load %arg8[%c0_22, %c0_23] : memref<16x32xf32, #tpu.memory_space<vmem>>, vector<16x32xf32>
    tpu.vector_store %arg8[%c0_22, %c0_23], %45 {strides = array<i32>} : memref<16x32xf32, #tpu.memory_space<vmem>>, vector<16x32xf32>,
    return
  }
  func.func @transform_0(%arg0: i32) -> (i32, i32) {
    %c0_i32 = arith.constant 0 : i32
    %c0_i32_0 = arith.constant 0 : i32
    return %arg0, %c0_i32 : i32, i32
  }
  func.func @transform_1(%arg0: i32) -> (i32, i32) {
    %c0_i32 = arith.constant 0 : i32
    %c0_i32_0 = arith.constant 0 : i32
    %c0_i32_1 = arith.constant 0 : i32
    return %c0_i32, %c0_i32_0 : i32, i32
  }
  func.func @transform_2(%arg0: i32) -> (i32, i32) {
    %c0_i32 = arith.constant 0 : i32
    %c0_i32_0 = arith.constant 0 : i32
    %c0_i32_1 = arith.constant 0 : i32
    return %c0_i32, %c0_i32_0 : i32, i32
  }
  func.func @transform_3(%arg0: i32) -> (i32, i32) {
    %c0_i32 = arith.constant 0 : i32
    %c0_i32_0 = arith.constant 0 : i32
    %c0_i32_1 = arith.constant 0 : i32
    return %c0_i32, %c0_i32_0 : i32, i32
  }
  func.func @transform_4(%arg0: i32) -> (i32, i32) {
    %c0_i32 = arith.constant 0 : i32
    %c0_i32_0 = arith.constant 0 : i32
    %c0_i32_1 = arith.constant 0 : i32
    return %c0_i32, %c0_i32_0 : i32, i32
  }
  func.func @transform_5(%arg0: i32) -> (i32, i32) {
    %c0_i32 = arith.constant 0 : i32
    %c0_i32_0 = arith.constant 0 : i32
    %c0_i32_1 = arith.constant 0 : i32
    return %c0_i32, %c0_i32_0 : i32, i32
  }
  func.func @transform_6(%arg0: i32) -> (i32, i32) {
    %c0_i32 = arith.constant 0 : i32
    %c0_i32_0 = arith.constant 0 : i32
    %c0_i32_1 = arith.constant 0 : i32
    return %c0_i32, %c0_i32_0 : i32, i32
  }
  func.func @transform_7(%arg0: i32) -> (i32, i32) {
    %c0_i32 = arith.constant 0 : i32
    %c0_i32_0 = arith.constant 0 : i32
    return %arg0, %c0_i32 : i32, i32
  }
}

module attributes {stable_mosaic.version = 11 : i64} {
  func.func @_attn_outproj_kernel(%arg0: i32, %arg1: memref<8x96xbf16, #tpu.memory_space<vmem>>, %arg2: memref<8x32xf32, #tpu.memory_space<vmem>>, %arg3: memref<32x32xbf16, #tpu.memory_space<vmem>>, %arg4: memref<1x32xf32, #tpu.memory_space<vmem>>, %arg5: memref<8x32xf32, #tpu.memory_space<vmem>>) attributes {dimension_semantics = [#tpu.dimension_semantics<parallel>], iteration_bounds = array<i64: 2>, scalar_prefetch = 0 : i64, scratch_operands = 0 : i64, tpu.core_type = #tpu.core_type<tc>, window_params = [{transform_indices = @transform_0, window_bounds = array<i64: 8, 96>}, {transform_indices = @transform_1, window_bounds = array<i64: 8, 32>}, {pipeline_mode = #tpu.pipeline_mode<synchronous>, transform_indices = @transform_2, window_bounds = array<i64: 32, 32>}, {pipeline_mode = #tpu.pipeline_mode<synchronous>, transform_indices = @transform_3, window_bounds = array<i64: 1, 32>}, {transform_indices = @transform_4, window_bounds = array<i64: 8, 32>}]} {
    %c0 = arith.constant 0 : index
    %c0_0 = arith.constant 0 : index
    %0 = vector.load %arg1[%c0, %c0_0] : memref<8x96xbf16, #tpu.memory_space<vmem>>, vector<8x96xbf16>
    %c0_1 = arith.constant 0 : index
    %c0_2 = arith.constant 0 : index
    %1 = vector.load %arg3[%c0_1, %c0_2] : memref<32x32xbf16, #tpu.memory_space<vmem>>, vector<32x32xbf16>
    %c0_3 = arith.constant 0 : index
    %c0_4 = arith.constant 0 : index
    %2 = vector.load %arg2[%c0_3, %c0_4] : memref<8x32xf32, #tpu.memory_space<vmem>>, vector<8x32xf32>
    %c0_5 = arith.constant 0 : index
    %c0_6 = arith.constant 0 : index
    %3 = vector.load %arg4[%c0_5, %c0_6] : memref<1x32xf32, #tpu.memory_space<vmem>>, vector<1x32xf32>
    %4 = vector.broadcast %3 : vector<1x32xf32> to vector<8x32xf32>
    %5 = arith.addf %2, %4 : vector<8x32xf32>
    %6 = vector.extract_strided_slice %0 {offsets = [0, 0], sizes = [8, 8], strides = [1, 1]} : vector<8x96xbf16> to vector<8x8xbf16>
    %7 = vector.extract_strided_slice %0 {offsets = [0, 32], sizes = [8, 8], strides = [1, 1]} : vector<8x96xbf16> to vector<8x8xbf16>
    %8 = vector.extract_strided_slice %0 {offsets = [0, 64], sizes = [8, 8], strides = [1, 1]} : vector<8x96xbf16> to vector<8x8xbf16>
    %cst = arith.constant dense<0.000000e+00> : vector<8x8xf32>
    %9 = tpu.matmul %6, %7, %cst {dimension_numbers = #tpu.dot_dimension_numbers<[1], [1], [0], [0], [0, 0, 1, 0], [], []>} : vector<8x8xbf16>, vector<8x8xbf16>, vector<8x8xf32> -> vector<8x8xf32>
    %cst_7 = arith.constant 0.353553385 : f32
    %10 = vector.broadcast %cst_7 : f32 to vector<8x8xf32>
    %11 = arith.mulf %9, %10 : vector<8x8xf32>
    %cst_8 = arith.constant dense<0xFF800000> : vector<8xf32>
    %12 = vector.multi_reduction <maximumf>, %11, %cst_8 [1] : vector<8x8xf32> to vector<8xf32>
    %13 = vector.shape_cast %12 : vector<8xf32> to vector<8x1xf32>
    %14 = vector.broadcast %13 : vector<8x1xf32> to vector<8x8xf32>
    %15 = arith.subf %11, %14 : vector<8x8xf32>
    %16 = math.exp %15 : vector<8x8xf32>
    %cst_9 = arith.constant dense<0.000000e+00> : vector<8xf32>
    %17 = vector.multi_reduction <add>, %16, %cst_9 [1] : vector<8x8xf32> to vector<8xf32>
    %18 = vector.shape_cast %17 : vector<8xf32> to vector<8x1xf32>
    %19 = tpu.reciprocal %18 {approx = true} : vector<8x1xf32> -> vector<8x1xf32>
    %20 = vector.broadcast %19 : vector<8x1xf32> to vector<8x8xf32>
    %21 = arith.mulf %16, %20 : vector<8x8xf32>
    %22 = arith.truncf %21 : vector<8x8xf32> to vector<8x8xbf16>
    %cst_10 = arith.constant dense<0.000000e+00> : vector<8x8xf32>
    %23 = tpu.matmul %22, %8, %cst_10 {dimension_numbers = #tpu.dot_dimension_numbers<[1], [0], [0], [1], [0, 0, 1, 1], [], []>} : vector<8x8xbf16>, vector<8x8xbf16>, vector<8x8xf32> -> vector<8x8xf32>
    %24 = vector.extract_strided_slice %1 {offsets = [0, 0], sizes = [8, 32], strides = [1, 1]} : vector<32x32xbf16> to vector<8x32xbf16>
    %25 = arith.truncf %23 : vector<8x8xf32> to vector<8x8xbf16>
    %cst_11 = arith.constant dense<0.000000e+00> : vector<8x32xf32>
    %26 = tpu.matmul %25, %24, %cst_11 {dimension_numbers = #tpu.dot_dimension_numbers<[1], [0], [0], [1], [0, 0, 1, 1], [], []>} : vector<8x8xbf16>, vector<8x32xbf16>, vector<8x32xf32> -> vector<8x32xf32>
    %27 = arith.addf %5, %26 : vector<8x32xf32>
    %28 = vector.extract_strided_slice %0 {offsets = [0, 8], sizes = [8, 8], strides = [1, 1]} : vector<8x96xbf16> to vector<8x8xbf16>
    %29 = vector.extract_strided_slice %0 {offsets = [0, 40], sizes = [8, 8], strides = [1, 1]} : vector<8x96xbf16> to vector<8x8xbf16>
    %30 = vector.extract_strided_slice %0 {offsets = [0, 72], sizes = [8, 8], strides = [1, 1]} : vector<8x96xbf16> to vector<8x8xbf16>
    %cst_12 = arith.constant dense<0.000000e+00> : vector<8x8xf32>
    %31 = tpu.matmul %28, %29, %cst_12 {dimension_numbers = #tpu.dot_dimension_numbers<[1], [1], [0], [0], [0, 0, 1, 0], [], []>} : vector<8x8xbf16>, vector<8x8xbf16>, vector<8x8xf32> -> vector<8x8xf32>
    %cst_13 = arith.constant 0.353553385 : f32
    %32 = vector.broadcast %cst_13 : f32 to vector<8x8xf32>
    %33 = arith.mulf %31, %32 : vector<8x8xf32>
    %cst_14 = arith.constant dense<0xFF800000> : vector<8xf32>
    %34 = vector.multi_reduction <maximumf>, %33, %cst_14 [1] : vector<8x8xf32> to vector<8xf32>
    %35 = vector.shape_cast %34 : vector<8xf32> to vector<8x1xf32>
    %36 = vector.broadcast %35 : vector<8x1xf32> to vector<8x8xf32>
    %37 = arith.subf %33, %36 : vector<8x8xf32>
    %38 = math.exp %37 : vector<8x8xf32>
    %cst_15 = arith.constant dense<0.000000e+00> : vector<8xf32>
    %39 = vector.multi_reduction <add>, %38, %cst_15 [1] : vector<8x8xf32> to vector<8xf32>
    %40 = vector.shape_cast %39 : vector<8xf32> to vector<8x1xf32>
    %41 = tpu.reciprocal %40 {approx = true} : vector<8x1xf32> -> vector<8x1xf32>
    %42 = vector.broadcast %41 : vector<8x1xf32> to vector<8x8xf32>
    %43 = arith.mulf %38, %42 : vector<8x8xf32>
    %44 = arith.truncf %43 : vector<8x8xf32> to vector<8x8xbf16>
    %cst_16 = arith.constant dense<0.000000e+00> : vector<8x8xf32>
    %45 = tpu.matmul %44, %30, %cst_16 {dimension_numbers = #tpu.dot_dimension_numbers<[1], [0], [0], [1], [0, 0, 1, 1], [], []>} : vector<8x8xbf16>, vector<8x8xbf16>, vector<8x8xf32> -> vector<8x8xf32>
    %46 = vector.extract_strided_slice %1 {offsets = [8, 0], sizes = [8, 32], strides = [1, 1]} : vector<32x32xbf16> to vector<8x32xbf16>
    %47 = arith.truncf %45 : vector<8x8xf32> to vector<8x8xbf16>
    %cst_17 = arith.constant dense<0.000000e+00> : vector<8x32xf32>
    %48 = tpu.matmul %47, %46, %cst_17 {dimension_numbers = #tpu.dot_dimension_numbers<[1], [0], [0], [1], [0, 0, 1, 1], [], []>} : vector<8x8xbf16>, vector<8x32xbf16>, vector<8x32xf32> -> vector<8x32xf32>
    %49 = arith.addf %27, %48 : vector<8x32xf32>
    %50 = vector.extract_strided_slice %0 {offsets = [0, 16], sizes = [8, 8], strides = [1, 1]} : vector<8x96xbf16> to vector<8x8xbf16>
    %51 = vector.extract_strided_slice %0 {offsets = [0, 48], sizes = [8, 8], strides = [1, 1]} : vector<8x96xbf16> to vector<8x8xbf16>
    %52 = vector.extract_strided_slice %0 {offsets = [0, 80], sizes = [8, 8], strides = [1, 1]} : vector<8x96xbf16> to vector<8x8xbf16>
    %cst_18 = arith.constant dense<0.000000e+00> : vector<8x8xf32>
    %53 = tpu.matmul %50, %51, %cst_18 {dimension_numbers = #tpu.dot_dimension_numbers<[1], [1], [0], [0], [0, 0, 1, 0], [], []>} : vector<8x8xbf16>, vector<8x8xbf16>, vector<8x8xf32> -> vector<8x8xf32>
    %cst_19 = arith.constant 0.353553385 : f32
    %54 = vector.broadcast %cst_19 : f32 to vector<8x8xf32>
    %55 = arith.mulf %53, %54 : vector<8x8xf32>
    %cst_20 = arith.constant dense<0xFF800000> : vector<8xf32>
    %56 = vector.multi_reduction <maximumf>, %55, %cst_20 [1] : vector<8x8xf32> to vector<8xf32>
    %57 = vector.shape_cast %56 : vector<8xf32> to vector<8x1xf32>
    %58 = vector.broadcast %57 : vector<8x1xf32> to vector<8x8xf32>
    %59 = arith.subf %55, %58 : vector<8x8xf32>
    %60 = math.exp %59 : vector<8x8xf32>
    %cst_21 = arith.constant dense<0.000000e+00> : vector<8xf32>
    %61 = vector.multi_reduction <add>, %60, %cst_21 [1] : vector<8x8xf32> to vector<8xf32>
    %62 = vector.shape_cast %61 : vector<8xf32> to vector<8x1xf32>
    %63 = tpu.reciprocal %62 {approx = true} : vector<8x1xf32> -> vector<8x1xf32>
    %64 = vector.broadcast %63 : vector<8x1xf32> to vector<8x8xf32>
    %65 = arith.mulf %60, %64 : vector<8x8xf32>
    %66 = arith.truncf %65 : vector<8x8xf32> to vector<8x8xbf16>
    %cst_22 = arith.constant dense<0.000000e+00> : vector<8x8xf32>
    %67 = tpu.matmul %66, %52, %cst_22 {dimension_numbers = #tpu.dot_dimension_numbers<[1], [0], [0], [1], [0, 0, 1, 1], [], []>} : vector<8x8xbf16>, vector<8x8xbf16>, vector<8x8xf32> -> vector<8x8xf32>
    %68 = vector.extract_strided_slice %1 {offsets = [16, 0], sizes = [8, 32], strides = [1, 1]} : vector<32x32xbf16> to vector<8x32xbf16>
    %69 = arith.truncf %67 : vector<8x8xf32> to vector<8x8xbf16>
    %cst_23 = arith.constant dense<0.000000e+00> : vector<8x32xf32>
    %70 = tpu.matmul %69, %68, %cst_23 {dimension_numbers = #tpu.dot_dimension_numbers<[1], [0], [0], [1], [0, 0, 1, 1], [], []>} : vector<8x8xbf16>, vector<8x32xbf16>, vector<8x32xf32> -> vector<8x32xf32>
    %71 = arith.addf %49, %70 : vector<8x32xf32>
    %72 = vector.extract_strided_slice %0 {offsets = [0, 24], sizes = [8, 8], strides = [1, 1]} : vector<8x96xbf16> to vector<8x8xbf16>
    %73 = vector.extract_strided_slice %0 {offsets = [0, 56], sizes = [8, 8], strides = [1, 1]} : vector<8x96xbf16> to vector<8x8xbf16>
    %74 = vector.extract_strided_slice %0 {offsets = [0, 88], sizes = [8, 8], strides = [1, 1]} : vector<8x96xbf16> to vector<8x8xbf16>
    %cst_24 = arith.constant dense<0.000000e+00> : vector<8x8xf32>
    %75 = tpu.matmul %72, %73, %cst_24 {dimension_numbers = #tpu.dot_dimension_numbers<[1], [1], [0], [0], [0, 0, 1, 0], [], []>} : vector<8x8xbf16>, vector<8x8xbf16>, vector<8x8xf32> -> vector<8x8xf32>
    %cst_25 = arith.constant 0.353553385 : f32
    %76 = vector.broadcast %cst_25 : f32 to vector<8x8xf32>
    %77 = arith.mulf %75, %76 : vector<8x8xf32>
    %cst_26 = arith.constant dense<0xFF800000> : vector<8xf32>
    %78 = vector.multi_reduction <maximumf>, %77, %cst_26 [1] : vector<8x8xf32> to vector<8xf32>
    %79 = vector.shape_cast %78 : vector<8xf32> to vector<8x1xf32>
    %80 = vector.broadcast %79 : vector<8x1xf32> to vector<8x8xf32>
    %81 = arith.subf %77, %80 : vector<8x8xf32>
    %82 = math.exp %81 : vector<8x8xf32>
    %cst_27 = arith.constant dense<0.000000e+00> : vector<8xf32>
    %83 = vector.multi_reduction <add>, %82, %cst_27 [1] : vector<8x8xf32> to vector<8xf32>
    %84 = vector.shape_cast %83 : vector<8xf32> to vector<8x1xf32>
    %85 = tpu.reciprocal %84 {approx = true} : vector<8x1xf32> -> vector<8x1xf32>
    %86 = vector.broadcast %85 : vector<8x1xf32> to vector<8x8xf32>
    %87 = arith.mulf %82, %86 : vector<8x8xf32>
    %88 = arith.truncf %87 : vector<8x8xf32> to vector<8x8xbf16>
    %cst_28 = arith.constant dense<0.000000e+00> : vector<8x8xf32>
    %89 = tpu.matmul %88, %74, %cst_28 {dimension_numbers = #tpu.dot_dimension_numbers<[1], [0], [0], [1], [0, 0, 1, 1], [], []>} : vector<8x8xbf16>, vector<8x8xbf16>, vector<8x8xf32> -> vector<8x8xf32>
    %90 = vector.extract_strided_slice %1 {offsets = [24, 0], sizes = [8, 32], strides = [1, 1]} : vector<32x32xbf16> to vector<8x32xbf16>
    %91 = arith.truncf %89 : vector<8x8xf32> to vector<8x8xbf16>
    %cst_29 = arith.constant dense<0.000000e+00> : vector<8x32xf32>
    %92 = tpu.matmul %91, %90, %cst_29 {dimension_numbers = #tpu.dot_dimension_numbers<[1], [0], [0], [1], [0, 0, 1, 1], [], []>} : vector<8x8xbf16>, vector<8x32xbf16>, vector<8x32xf32> -> vector<8x32xf32>
    %93 = arith.addf %71, %92 : vector<8x32xf32>
    %c0_30 = arith.constant 0 : index
    %c0_31 = arith.constant 0 : index
    %94 = vector.load %arg5[%c0_30, %c0_31] : memref<8x32xf32, #tpu.memory_space<vmem>>, vector<8x32xf32>
    tpu.vector_store %arg5[%c0_30, %c0_31], %93 {strides = array<i32>} : memref<8x32xf32, #tpu.memory_space<vmem>>, vector<8x32xf32>,
    return
  }
  func.func @transform_0(%arg0: i32) -> (i32, i32) {
    %c0_i32 = arith.constant 0 : i32
    %c0_i32_0 = arith.constant 0 : i32
    return %arg0, %c0_i32 : i32, i32
  }
  func.func @transform_1(%arg0: i32) -> (i32, i32) {
    %c0_i32 = arith.constant 0 : i32
    %c0_i32_0 = arith.constant 0 : i32
    return %arg0, %c0_i32 : i32, i32
  }
  func.func @transform_2(%arg0: i32) -> (i32, i32) {
    %c0_i32 = arith.constant 0 : i32
    %c0_i32_0 = arith.constant 0 : i32
    %c0_i32_1 = arith.constant 0 : i32
    return %c0_i32, %c0_i32_0 : i32, i32
  }
  func.func @transform_3(%arg0: i32) -> (i32, i32) {
    %c0_i32 = arith.constant 0 : i32
    %c0_i32_0 = arith.constant 0 : i32
    %c0_i32_1 = arith.constant 0 : i32
    return %c0_i32, %c0_i32_0 : i32, i32
  }
  func.func @transform_4(%arg0: i32) -> (i32, i32) {
    %c0_i32 = arith.constant 0 : i32
    %c0_i32_0 = arith.constant 0 : i32
    return %arg0, %c0_i32 : i32, i32
  }
}

module attributes {stable_mosaic.version = 11 : i64} {
  func.func @_ln_qkv_kernel(%arg0: i32, %arg1: memref<16x32xf32, #tpu.memory_space<vmem>>, %arg2: memref<1x32xf32, #tpu.memory_space<vmem>>, %arg3: memref<1x32xf32, #tpu.memory_space<vmem>>, %arg4: memref<32x96xbf16, #tpu.memory_space<vmem>>, %arg5: memref<1x96xf32, #tpu.memory_space<vmem>>, %arg6: memref<16x96xbf16, #tpu.memory_space<vmem>>) attributes {dimension_semantics = [#tpu.dimension_semantics<parallel>], iteration_bounds = array<i64: 1>, scalar_prefetch = 0 : i64, scratch_operands = 0 : i64, tpu.core_type = #tpu.core_type<tc>, window_params = [{transform_indices = @transform_0, window_bounds = array<i64: 16, 32>}, {pipeline_mode = #tpu.pipeline_mode<synchronous>, transform_indices = @transform_1, window_bounds = array<i64: 1, 32>}, {pipeline_mode = #tpu.pipeline_mode<synchronous>, transform_indices = @transform_2, window_bounds = array<i64: 1, 32>}, {pipeline_mode = #tpu.pipeline_mode<synchronous>, transform_indices = @transform_3, window_bounds = array<i64: 32, 96>}, {pipeline_mode = #tpu.pipeline_mode<synchronous>, transform_indices = @transform_4, window_bounds = array<i64: 1, 96>}, {transform_indices = @transform_5, window_bounds = array<i64: 16, 96>}]} {
    %c0 = arith.constant 0 : index
    %c0_0 = arith.constant 0 : index
    %0 = vector.load %arg1[%c0, %c0_0] : memref<16x32xf32, #tpu.memory_space<vmem>>, vector<16x32xf32>
    %c0_1 = arith.constant 0 : index
    %c0_2 = arith.constant 0 : index
    %1 = vector.load %arg2[%c0_1, %c0_2] : memref<1x32xf32, #tpu.memory_space<vmem>>, vector<1x32xf32>
    %c0_3 = arith.constant 0 : index
    %c0_4 = arith.constant 0 : index
    %2 = vector.load %arg3[%c0_3, %c0_4] : memref<1x32xf32, #tpu.memory_space<vmem>>, vector<1x32xf32>
    %cst = arith.constant dense<0.000000e+00> : vector<16xf32>
    %3 = vector.multi_reduction <add>, %0, %cst [1] : vector<16x32xf32> to vector<16xf32>
    %4 = vector.shape_cast %3 : vector<16xf32> to vector<16x1xf32>
    %cst_5 = arith.constant 3.200000e+01 : f32
    %5 = vector.broadcast %cst_5 : f32 to vector<16x1xf32>
    %6 = arith.divf %4, %5 : vector<16x1xf32>
    %7 = vector.broadcast %6 : vector<16x1xf32> to vector<16x32xf32>
    %8 = arith.subf %0, %7 : vector<16x32xf32>
    %9 = arith.mulf %8, %8 : vector<16x32xf32>
    %cst_6 = arith.constant dense<0.000000e+00> : vector<16xf32>
    %10 = vector.multi_reduction <add>, %9, %cst_6 [1] : vector<16x32xf32> to vector<16xf32>
    %11 = vector.shape_cast %10 : vector<16xf32> to vector<16x1xf32>
    %cst_7 = arith.constant 3.200000e+01 : f32
    %12 = vector.broadcast %cst_7 : f32 to vector<16x1xf32>
    %13 = arith.divf %11, %12 : vector<16x1xf32>
    %14 = vector.broadcast %6 : vector<16x1xf32> to vector<16x32xf32>
    %15 = arith.subf %0, %14 : vector<16x32xf32>
    %cst_8 = arith.constant 9.99999997E-7 : f32
    %16 = vector.broadcast %cst_8 : f32 to vector<16x1xf32>
    %17 = arith.addf %13, %16 : vector<16x1xf32>
    %18 = math.rsqrt %17 : vector<16x1xf32>
    %19 = vector.broadcast %18 : vector<16x1xf32> to vector<16x32xf32>
    %20 = arith.mulf %15, %19 : vector<16x32xf32>
    %21 = vector.broadcast %1 : vector<1x32xf32> to vector<16x32xf32>
    %22 = arith.mulf %20, %21 : vector<16x32xf32>
    %23 = vector.broadcast %2 : vector<1x32xf32> to vector<16x32xf32>
    %24 = arith.addf %22, %23 : vector<16x32xf32>
    %25 = arith.truncf %24 : vector<16x32xf32> to vector<16x32xbf16>
    %c0_9 = arith.constant 0 : index
    %c0_10 = arith.constant 0 : index
    %26 = vector.load %arg4[%c0_9, %c0_10] : memref<32x96xbf16, #tpu.memory_space<vmem>>, vector<32x96xbf16>
    %cst_11 = arith.constant dense<0.000000e+00> : vector<16x96xf32>
    %27 = tpu.matmul %25, %26, %cst_11 {dimension_numbers = #tpu.dot_dimension_numbers<[1], [0], [0], [1], [0, 0, 1, 1], [], []>} : vector<16x32xbf16>, vector<32x96xbf16>, vector<16x96xf32> -> vector<16x96xf32>
    %c0_12 = arith.constant 0 : index
    %c0_13 = arith.constant 0 : index
    %28 = vector.load %arg5[%c0_12, %c0_13] : memref<1x96xf32, #tpu.memory_space<vmem>>, vector<1x96xf32>
    %29 = vector.broadcast %28 : vector<1x96xf32> to vector<16x96xf32>
    %30 = arith.addf %27, %29 : vector<16x96xf32>
    %31 = arith.truncf %30 : vector<16x96xf32> to vector<16x96xbf16>
    %c0_14 = arith.constant 0 : index
    %c0_15 = arith.constant 0 : index
    %32 = vector.load %arg6[%c0_14, %c0_15] : memref<16x96xbf16, #tpu.memory_space<vmem>>, vector<16x96xbf16>
    tpu.vector_store %arg6[%c0_14, %c0_15], %31 {strides = array<i32>} : memref<16x96xbf16, #tpu.memory_space<vmem>>, vector<16x96xbf16>,
    return
  }
  func.func @transform_0(%arg0: i32) -> (i32, i32) {
    %c0_i32 = arith.constant 0 : i32
    %c0_i32_0 = arith.constant 0 : i32
    return %arg0, %c0_i32 : i32, i32
  }
  func.func @transform_1(%arg0: i32) -> (i32, i32) {
    %c0_i32 = arith.constant 0 : i32
    %c0_i32_0 = arith.constant 0 : i32
    %c0_i32_1 = arith.constant 0 : i32
    return %c0_i32, %c0_i32_0 : i32, i32
  }
  func.func @transform_2(%arg0: i32) -> (i32, i32) {
    %c0_i32 = arith.constant 0 : i32
    %c0_i32_0 = arith.constant 0 : i32
    %c0_i32_1 = arith.constant 0 : i32
    return %c0_i32, %c0_i32_0 : i32, i32
  }
  func.func @transform_3(%arg0: i32) -> (i32, i32) {
    %c0_i32 = arith.constant 0 : i32
    %c0_i32_0 = arith.constant 0 : i32
    %c0_i32_1 = arith.constant 0 : i32
    return %c0_i32, %c0_i32_0 : i32, i32
  }
  func.func @transform_4(%arg0: i32) -> (i32, i32) {
    %c0_i32 = arith.constant 0 : i32
    %c0_i32_0 = arith.constant 0 : i32
    %c0_i32_1 = arith.constant 0 : i32
    return %c0_i32, %c0_i32_0 : i32, i32
  }
  func.func @transform_5(%arg0: i32) -> (i32, i32) {
    %c0_i32 = arith.constant 0 : i32
    %c0_i32_0 = arith.constant 0 : i32
    return %arg0, %c0_i32 : i32, i32
  }
}

module attributes {stable_mosaic.version = 11 : i64} {
  func.func @_final_ln_kernel(%arg0: i32, %arg1: memref<16x32xf32, #tpu.memory_space<vmem>>, %arg2: memref<1x32xf32, #tpu.memory_space<vmem>>, %arg3: memref<1x32xf32, #tpu.memory_space<vmem>>, %arg4: memref<16x32xf32, #tpu.memory_space<vmem>>) attributes {dimension_semantics = [#tpu.dimension_semantics<parallel>], iteration_bounds = array<i64: 1>, scalar_prefetch = 0 : i64, scratch_operands = 0 : i64, tpu.core_type = #tpu.core_type<tc>, window_params = [{transform_indices = @transform_0, window_bounds = array<i64: 16, 32>}, {pipeline_mode = #tpu.pipeline_mode<synchronous>, transform_indices = @transform_1, window_bounds = array<i64: 1, 32>}, {pipeline_mode = #tpu.pipeline_mode<synchronous>, transform_indices = @transform_2, window_bounds = array<i64: 1, 32>}, {transform_indices = @transform_3, window_bounds = array<i64: 16, 32>}]} {
    %c0 = arith.constant 0 : index
    %c0_0 = arith.constant 0 : index
    %0 = vector.load %arg1[%c0, %c0_0] : memref<16x32xf32, #tpu.memory_space<vmem>>, vector<16x32xf32>
    %c0_1 = arith.constant 0 : index
    %c0_2 = arith.constant 0 : index
    %1 = vector.load %arg2[%c0_1, %c0_2] : memref<1x32xf32, #tpu.memory_space<vmem>>, vector<1x32xf32>
    %c0_3 = arith.constant 0 : index
    %c0_4 = arith.constant 0 : index
    %2 = vector.load %arg3[%c0_3, %c0_4] : memref<1x32xf32, #tpu.memory_space<vmem>>, vector<1x32xf32>
    %cst = arith.constant dense<0.000000e+00> : vector<16xf32>
    %3 = vector.multi_reduction <add>, %0, %cst [1] : vector<16x32xf32> to vector<16xf32>
    %4 = vector.shape_cast %3 : vector<16xf32> to vector<16x1xf32>
    %cst_5 = arith.constant 3.200000e+01 : f32
    %5 = vector.broadcast %cst_5 : f32 to vector<16x1xf32>
    %6 = arith.divf %4, %5 : vector<16x1xf32>
    %7 = vector.broadcast %6 : vector<16x1xf32> to vector<16x32xf32>
    %8 = arith.subf %0, %7 : vector<16x32xf32>
    %9 = arith.mulf %8, %8 : vector<16x32xf32>
    %cst_6 = arith.constant dense<0.000000e+00> : vector<16xf32>
    %10 = vector.multi_reduction <add>, %9, %cst_6 [1] : vector<16x32xf32> to vector<16xf32>
    %11 = vector.shape_cast %10 : vector<16xf32> to vector<16x1xf32>
    %cst_7 = arith.constant 3.200000e+01 : f32
    %12 = vector.broadcast %cst_7 : f32 to vector<16x1xf32>
    %13 = arith.divf %11, %12 : vector<16x1xf32>
    %14 = vector.broadcast %6 : vector<16x1xf32> to vector<16x32xf32>
    %15 = arith.subf %0, %14 : vector<16x32xf32>
    %cst_8 = arith.constant 9.99999997E-7 : f32
    %16 = vector.broadcast %cst_8 : f32 to vector<16x1xf32>
    %17 = arith.addf %13, %16 : vector<16x1xf32>
    %18 = math.rsqrt %17 : vector<16x1xf32>
    %19 = vector.broadcast %18 : vector<16x1xf32> to vector<16x32xf32>
    %20 = arith.mulf %15, %19 : vector<16x32xf32>
    %21 = vector.broadcast %1 : vector<1x32xf32> to vector<16x32xf32>
    %22 = arith.mulf %20, %21 : vector<16x32xf32>
    %23 = vector.broadcast %2 : vector<1x32xf32> to vector<16x32xf32>
    %24 = arith.addf %22, %23 : vector<16x32xf32>
    %c0_9 = arith.constant 0 : index
    %c0_10 = arith.constant 0 : index
    %25 = vector.load %arg4[%c0_9, %c0_10] : memref<16x32xf32, #tpu.memory_space<vmem>>, vector<16x32xf32>
    tpu.vector_store %arg4[%c0_9, %c0_10], %24 {strides = array<i32>} : memref<16x32xf32, #tpu.memory_space<vmem>>, vector<16x32xf32>,
    return
  }
  func.func @transform_0(%arg0: i32) -> (i32, i32) {
    %c0_i32 = arith.constant 0 : i32
    %c0_i32_0 = arith.constant 0 : i32
    return %arg0, %c0_i32 : i32, i32
  }
  func.func @transform_1(%arg0: i32) -> (i32, i32) {
    %c0_i32 = arith.constant 0 : i32
    %c0_i32_0 = arith.constant 0 : i32
    %c0_i32_1 = arith.constant 0 : i32
    return %c0_i32, %c0_i32_0 : i32, i32
  }
  func.func @transform_2(%arg0: i32) -> (i32, i32) {
    %c0_i32 = arith.constant 0 : i32
    %c0_i32_0 = arith.constant 0 : i32
    %c0_i32_1 = arith.constant 0 : i32
    return %c0_i32, %c0_i32_0 : i32, i32
  }
  func.func @transform_3(%arg0: i32) -> (i32, i32) {
    %c0_i32 = arith.constant 0 : i32
    %c0_i32_0 = arith.constant 0 : i32
    return %arg0, %c0_i32 : i32, i32
  }
}

</mosaic_0001>

<bundles_post_ra>
// kernel: transformer_decoder_forward.7
= control target key start
LH: loop header
LB: loop body
LE: loop exit
PB: predicated region body
PF: predicated region fallthrough
CT: control target
= control target key end

     0   :  { %10 = vsyncpa [#allocation3], 0  ;;  %s223_s18 = smov [#allocation2]   ;;  %s296_s0 = inlined_call_operand.hbm [shape: f32[16,32], index: 0, kind: input, shape index: {}]   ;;  %s297_s1 = inlined_call_operand.vmem [shape: f32[1,32], index: 1, kind: input, shape index: {}]   ;;  %s298_s2 = inlined_call_operand.vmem [shape: f32[1,32], index: 2, kind: input, shape index: {}]   ;;  %s299_s3 = inlined_call_operand.vmem [shape: bf16[32,96], index: 3, kind: input, shape index: {}]   ;;  %s300_s4 = inlined_call_operand.vmem [shape: f32[1,96], index: 4, kind: input, shape index: {}]   ;;  %s301_s5 = inlined_call_operand.vmem [shape: bf16[16,96], index: 5, kind: output, shape index: {}]  }
   0x1   :  { %s16_s19 = sshll.u32 %s223_s18, 4  ;;  %s199_s22 = scalar_lea.hbm %s296_s0, 256  ;;  %s17_s19 = int_to_ptr.vmem [resolvable:$true] %s16_s19 }
   0x2   :  { %p200_p0 = scmp.ne.s32.totalorder %s296_s0, %s199_s22  ;;  %p203_p1 = scmp.lt.u32.totalorder %s199_s22, %s296_s0 }
   0x4   :  { %p205_p2 = pnand %p203_p1, %p200_p0 }
   0x6   :  { %208 = shalt.err (!%p205_p2)
}
   0x7   :  { %s209_s27 = scalar_lea.vmem %s17_s19, 256  ;;  %p214_p4 = scmp.lt.s32.totalorder %s17_s19, %s17_s19 }
   0x8   :  { %p210_p3 = scmp.ne.s32.totalorder %s17_s19, %s209_s27  ;;  %p215_p5 = scmp.lt.s32.totalorder %s209_s27, %s209_s27 }
   0xa   :  { %p216_p6 = por %p215_p5, %p214_p4 }
   0xc   :  { %p217_p7 = pnand %p216_p6, %p210_p3 }
   0xe   :  { %220 = shalt.err (!%p217_p7)
}
   0xf   :  { %s224_s28 = smov 128   ;;  %s225_s29 = smov 8  }
  0x10   :  { %22 = dma.hbm_to_vmem [thread:$0]  %s296_s0, 256, %s17_s19, [#allocation3], %s224_s28, %s224_s28, %s225_s29  }
  0x11   :  { %221 = dma.done.wait [#allocation3], 256  }
  0x12   :  { %222 = vsyncadd [#allocation3], 4294967040  ;;  %vm39_vm0 = vcmask 261120   ;;  %v35_v0 = vld [vmem:[#allocation2] sm:$0xff]  ;;  %v36_v1 = vld [vmem:[#allocation2 + $0x8] sm:$0xff]  ;;  %v226_v15 = vmov 0.0  }
  0x13   :  { %v40_v2 = vsel %vm39_vm0, %v35_v0, 0.0  ;;  %v43_v3 = vsel %vm39_vm0, %v36_v1, 0.0  ;;  %v193_v14 = vld [vmem:[%s299_s3] sm:$0xff]   ;;  %180 = vmatprep.subr.bf16.mxu0 %v226_v15  ;;  %v194_v16 = vld [vmem:[%s299_s3 + $0x8] sm:$0xff]   ;;  %vm227_vm1 = vmmov 0   ;;  %vm159_vm2 = vcmask 781312  }
  0x14   :  { %41 = vadd.xlane.f32.xlu0 %v40_v2  ;;  %181 = vmatpush3.bf16.msra.mxu0 %v193_v14  ;;  %v167_v25 = vld [vmem:[%s297_s1] ss:$0 sm:$0xff] }
  0x15   :  { %184 = vmatprep.mubr.msk.bf16.mxu0 %vm227_vm1, %v226_v15  ;;  %182 = vmatprep.subr.bf16.mxu0 %v226_v15  ;;  %v168_v29 = vld [vmem:[%s298_s2] ss:$0 sm:$0xff] }
  0x16   :  { %v169_v34 = vld [vmem:[%s300_s4] ss:$0 sm:$0xff] }
  0x18   :  { %44 = vadd.xlane.f32.xlu0 %v43_v3  ;;  %183 = vmatpush3.bf16.msra.mxu0 %v194_v16 }
  0xa1   :  { %v42_v4 = vpop.xlane.xlu0 %41 }
  0xa2   :  { %v47_v5 = vmul.f32 0.03125, %v42_v4 }
  0xa4   :  { %v49_v6 = vsub.f32 %v35_v0, %v47_v5 }
  0xa5   :  { %v45_v7 = vpop.xlane.xlu0 %44 }
  0xa6   :  { %v48_v8 = vmul.f32 0.03125, %v45_v7  ;;  %v51_v9 = vmul.f32 %v49_v6, %v49_v6 }
  0xa8   :  { %v50_v10 = vsub.f32 %v36_v1, %v48_v8  ;;  %v53_v11 = vsel %vm39_vm0, %v51_v9, 0.0 }
  0xa9   :  { %54 = vadd.xlane.f32.xlu1 %v53_v11 }
  0xaa   :  { %v52_v12 = vmul.f32 %v50_v10, %v50_v10 }
  0xac   :  { %v56_v13 = vsel %vm39_vm0, %v52_v12, 0.0 }
  0xad   :  { %57 = vadd.xlane.f32.xlu1 %v56_v13 }
 0x136   :  { %v55_v17 = vpop.xlane.xlu1 %54 }
 0x137   :  { %v59_v18 = vmul.f32 0.03125, %v55_v17 }
 0x139   :  { %v61_v19 = vadd.f32 1e-06, %v59_v18 }
 0x13a   :  { %v58_v20 = vpop.xlane.xlu1 %57 }
 0x13b   :  { %195 = vrsqrt.f32 %v61_v19  ;;  %v60_v21 = vmul.f32 0.03125, %v58_v20 }
 0x13d   :  { %v62_v22 = vadd.f32 1e-06, %v60_v21 }
 0x13f   :  { %197 = vrsqrt.f32 %v62_v22 }
 0x145   :  { %v196_v23 = vpop.eup %195 }
 0x146   :  { %v65_v24 = vmul.f32 %v196_v23, %v49_v6 }
 0x148   :  { %v73_v28 = vmul.f32 %v167_v25, %v65_v24 }
 0x149   :  { %v198_v26 = vpop.eup %197 }
 0x14a   :  { %v66_v27 = vmul.f32 %v198_v26, %v50_v10  ;;  %v81_v31 = vadd.f32 %v168_v29, %v73_v28 }
 0x14c   :  { %v74_v30 = vmul.f32 %v167_v25, %v66_v27 }
 0x14e   :  { %v82_v32 = vadd.f32 %v168_v29, %v74_v30 }
 0x150   :  { %v83_v33 = vpack.c.bf16 %v82_v32, %v81_v31 }
 0x152   :  { %185 = vmatmul.mubr.msk.bf16.vlgmr.msra.gmra.mrb[0].mxu0 %vm39_vm0, %v83_v33 }
 0x225   :  { %v144_v35 = vpop.f32.mrb[0].mxu0 }
 0x226   :  { %v145_v36 = vadd.f32 %v169_v34, %v144_v35  ;;  %v186_v37 = vpop.f32.mrb[1].mxu0 }
 0x227   :  { %v147_v38 = vpop.f32.mrb[2].mxu0 }
 0x228   :  { %v175_v39 = vpack.c.bf16 %v145_v36, %v145_v36  ;;  %v148_v40 = vadd.f32 %v169_v34, %v147_v38  ;;  %v187_v41 = vpop.f32.mrb[3].mxu0 }
 0x22a   :  { %160 = vst.msk [vmem:[%s301_s5] sm:$0xf] %vm159_vm2, %v175_v39  ;;  %v176_v42 = vpack.c.bf16 %v148_v40, %v148_v40 }
 0x22c   :  { %161 = vst.msk [vmem:[%s301_s5 + $0x4] sm:$0xf] %vm159_vm2, %v176_v42 }
 0x22d   :  { %166 = vsyncpa [#allocation3], 1 }

// kernel: transformer_decoder_forward.9
= control target key start
LH: loop header
LB: loop body
LE: loop exit
PB: predicated region body
PF: predicated region fallthrough
CT: control target
= control target key end

     0   :  { %vm31_vm0 = vcmask 261120   ;;  %v349_v15 = vmov 0.0   ;;  %vm350_vm1 = vmmov 0   ;;  %s462_s0 = inlined_call_operand.vmem [shape: f32[16,32], index: 0, kind: input, shape index: {}]   ;;  %s463_s3 = inlined_call_operand.vmem [shape: bf16[32,128], index: 3, kind: input, shape index: {}]   ;;  %s464_s5 = inlined_call_operand.vmem [shape: bf16[128,32], index: 5, kind: input, shape index: {}]   ;;  %s465_s1 = inlined_call_operand.vmem [shape: f32[1,32], index: 1, kind: input, shape index: {}]   ;;  %s466_s2 = inlined_call_operand.vmem [shape: f32[1,32], index: 2, kind: input, shape index: {}]   ;;  %s467_s4 = inlined_call_operand.vmem [shape: f32[1,128], index: 4, kind: input, shape index: {}]   ;;  %s468_s6 = inlined_call_operand.vmem [shape: f32[1,32], index: 6, kind: input, shape index: {}]   ;;  %s469_s7 = inlined_call_operand.vmem [shape: f32[16,32], index: 7, kind: output, shape index: {}]  }
   0x1   :  { %v394_v0 = vld [vmem:[%s462_s0] sm:$0xff]  ;;  %v399_v1 = vld [vmem:[%s462_s0 + $0x8] sm:$0xff]  ;;  %301 = vmatprep.subr.bf16.mxu0 %v349_v15  ;;  %309 = vmatprep.subr.bf16.mxu1 %v349_v15  ;;  %v335_v36 = vld [vmem:[%s464_s5 + $0x10] sm:$0xff]  }
   0x2   :  { %v32_v2 = vsel %vm31_vm0, %v394_v0, 0.0  ;;  %v35_v3 = vsel %vm31_vm0, %v399_v1, 0.0  ;;  %v331_v14 = vld [vmem:[%s463_s3] sm:$0xff]   ;;  %v332_v16 = vld [vmem:[%s463_s3 + $0x8] sm:$0xff]   ;;  %305 = vmatprep.mubr.msk.bf16.mxu0 %vm350_vm1, %v349_v15  ;;  %325 = vmatprep.mubr.msk.bf16.mxu1 %vm350_vm1, %v349_v15  ;;  %v336_v37 = vld [vmem:[%s464_s5 + $0x18] sm:$0xff]  }
   0x3   :  { %33 = vadd.xlane.f32.xlu0 %v32_v2  ;;  %302 = vmatpush3.bf16.msra.mxu0 %v331_v14  ;;  %v333_v17 = vld [vmem:[%s464_s5] sm:$0xff]   ;;  %v334_v18 = vld [vmem:[%s464_s5 + $0x8] sm:$0xff]   ;;  %v339_v40 = vld [vmem:[%s464_s5 + $0x30] sm:$0xff]  }
   0x4   :  { %303 = vmatprep.subr.bf16.mxu0 %v349_v15  ;;  %310 = vmatpush3.bf16.msra.mxu1 %v333_v17  ;;  %v274_v27 = vld [vmem:[%s465_s1] ss:$0 sm:$0xff]  ;;  %v338_v39 = vld [vmem:[%s464_s5 + $0x28] sm:$0xff]   ;;  %v340_v41 = vld [vmem:[%s464_s5 + $0x38] sm:$0xff]  }
   0x5   :  { %311 = vmatprep.subr.bf16.mxu1 %v349_v15  ;;  %v275_v31 = vld [vmem:[%s466_s2] ss:$0 sm:$0xff] }
   0x6   :  { %v337_v38 = vld [vmem:[%s464_s5 + $0x20] sm:$0xff]  }
   0x7   :  { %36 = vadd.xlane.f32.xlu0 %v35_v3  ;;  %304 = vmatpush3.bf16.msra.mxu0 %v332_v16  ;;  %v276_v42 = vld [vmem:[%s467_s4] ss:$0 sm:$0xff] }
   0x8   :  { %312 = vmatpush3.bf16.msra.mxu1 %v334_v18  ;;  %v280_v60 = vld [vmem:[%s468_s6] ss:$0 sm:$0xff] }
   0x9   :  { %313 = vmatprep.subr.bf16.mxu1 %v349_v15 }
   0xc   :  { %314 = vmatpush3.bf16.msra.mxu1 %v335_v36 }
   0xd   :  { %315 = vmatprep.subr.bf16.mxu1 %v349_v15 }
  0x10   :  { %316 = vmatpush3.bf16.msra.mxu1 %v336_v37 }
  0x11   :  { %317 = vmatprep.subr.bf16.mxu1 %v349_v15 }
  0x14   :  { %318 = vmatpush3.bf16.msra.mxu1 %v337_v38 }
  0x15   :  { %319 = vmatprep.subr.bf16.mxu1 %v349_v15 }
  0x18   :  { %320 = vmatpush3.bf16.msra.mxu1 %v338_v39 }
  0x19   :  { %321 = vmatprep.subr.bf16.mxu1 %v349_v15 }
  0x1c   :  { %322 = vmatpush3.bf16.msra.mxu1 %v339_v40 }
  0x1d   :  { %323 = vmatprep.subr.bf16.mxu1 %v349_v15 }
  0x20   :  { %324 = vmatpush3.bf16.msra.mxu1 %v340_v41 }
  0x90   :  { %v34_v4 = vpop.xlane.xlu0 %33 }
  0x91   :  { %v39_v5 = vmul.f32 0.03125, %v34_v4 }
  0x93   :  { %v41_v6 = vsub.f32 %v394_v0, %v39_v5 }
  0x94   :  { %v37_v7 = vpop.xlane.xlu0 %36 }
  0x95   :  { %v40_v8 = vmul.f32 0.03125, %v37_v7  ;;  %v43_v9 = vmul.f32 %v41_v6, %v41_v6 }
  0x97   :  { %v42_v10 = vsub.f32 %v399_v1, %v40_v8  ;;  %v45_v11 = vsel %vm31_vm0, %v43_v9, 0.0 }
  0x98   :  { %46 = vadd.xlane.f32.xlu1 %v45_v11 }
  0x99   :  { %v44_v12 = vmul.f32 %v42_v10, %v42_v10 }
  0x9b   :  { %v48_v13 = vsel %vm31_vm0, %v44_v12, 0.0 }
  0x9c   :  { %49 = vadd.xlane.f32.xlu1 %v48_v13 }
 0x125   :  { %v47_v19 = vpop.xlane.xlu1 %46 }
 0x126   :  { %v51_v20 = vmul.f32 0.03125, %v47_v19 }
 0x128   :  { %v53_v21 = vadd.f32 1e-06, %v51_v20 }
 0x129   :  { %v50_v22 = vpop.xlane.xlu1 %49 }
 0x12a   :  { %341 = vrsqrt.f32 %v53_v21  ;;  %v52_v23 = vmul.f32 0.03125, %v50_v22 }
 0x12c   :  { %v54_v24 = vadd.f32 1e-06, %v52_v23 }
 0x12e   :  { %343 = vrsqrt.f32 %v54_v24 }
 0x134   :  { %v342_v25 = vpop.eup %341 }
 0x135   :  { %v57_v26 = vmul.f32 %v342_v25, %v41_v6 }
 0x137   :  { %v65_v30 = vmul.f32 %v274_v27, %v57_v26 }
 0x138   :  { %v344_v28 = vpop.eup %343 }
 0x139   :  { %v58_v29 = vmul.f32 %v344_v28, %v42_v10  ;;  %v73_v33 = vadd.f32 %v275_v31, %v65_v30 }
 0x13b   :  { %v66_v32 = vmul.f32 %v274_v27, %v58_v29 }
 0x13d   :  { %v74_v34 = vadd.f32 %v275_v31, %v66_v32 }
 0x13f   :  { %v75_v35 = vpack.c.bf16 %v74_v34, %v73_v33 }
 0x141   :  { %306 = vmatmul.mubr.msk.bf16.vlgmr.msra.gmra.mrb[0].mxu0 %vm31_vm0, %v75_v35 }
 0x214   :  { %v136_v43 = vpop.f32.mrb[0].mxu0 }
 0x215   :  { %v137_v44 = vadd.f32 %v276_v42, %v136_v43  ;;  %v307_v45 = vpop.f32.mrb[1].mxu0 }
 0x216   :  { %v139_v46 = vpop.f32.mrb[2].mxu0 }
 0x217   :  { %v145_v47 = vmul.f32 0.70710677, %v137_v44  ;;  %v140_v48 = vadd.f32 %v276_v42, %v139_v46  ;;  %v308_v49 = vpop.f32.mrb[3].mxu0  ;;  %v143_v54 = vmul.f32 0.5, %v137_v44 }
 0x219   :  { %345 = verf.f32 %v145_v47  ;;  %v146_v50 = vmul.f32 0.70710677, %v140_v48  ;;  %v144_v55 = vmul.f32 0.5, %v140_v48 }
 0x21b   :  { %347 = verf.f32 %v146_v50 }
 0x223   :  { %v346_v51 = vpop.eup %345 }
 0x224   :  { %v149_v52 = vadd.f32 1.0, %v346_v51 }
 0x225   :  { %v348_v53 = vpop.eup %347 }
 0x226   :  { %v150_v56 = vadd.f32 1.0, %v348_v53  ;;  %v151_v57 = vmul.f32 %v149_v52, %v143_v54 }
 0x228   :  { %v152_v58 = vmul.f32 %v150_v56, %v144_v55 }
 0x22a   :  { %v153_v59 = vpack.c.bf16 %v152_v58, %v151_v57 }
 0x22c   :  { %326 = vmatmul.mubr.bf16.vlgmr.msra.gmra.mrb[0].mxu1 %v153_v59 }
 0x2ff   :  { %v259_v61 = vpop.f32.mrb[0].mxu1 }
 0x300   :  { %v260_v62 = vadd.f32 %v280_v60, %v259_v61  ;;  %v327_v63 = vpop.f32.mrb[1].mxu1 }
 0x301   :  { %v262_v2 = vpop.f32.mrb[2].mxu1 }
 0x302   :  { %v266_v3 = vadd.f32 %v260_v62, %v394_v0  ;;  %v263_v4 = vadd.f32 %v280_v60, %v262_v2  ;;  %v328_v5 = vpop.f32.mrb[3].mxu1 }
 0x304   :  { %268 = vst.msk [vmem:[%s469_s7] sm:$0xff] %vm31_vm0, %v266_v3  ;;  %v267_v6 = vadd.f32 %v263_v4, %v399_v1 }
 0x306   :  { %269 = vst.msk [vmem:[%s469_s7 + $0x8] sm:$0xff] %vm31_vm0, %v267_v6 }

// kernel: transformer_decoder_forward.8
= control target key start
LH: loop header
LB: loop body
LE: loop exit
PB: predicated region body
PF: predicated region fallthrough
CT: control target
= control target key end

     0   :  { %s1148_s15 = smov 0   ;;  %s1268_s0 = inlined_call_operand.vmem [shape: bf16[16,96], index: 0, kind: input, shape index: {}]   ;;  %s1269_s1 = inlined_call_operand.vmem [shape: f32[16,32], index: 1, kind: input, shape index: {}]   ;;  %s1270_s2 = inlined_call_operand.vmem [shape: bf16[32,32], index: 2, kind: input, shape index: {}]   ;;  %s1271_s3 = inlined_call_operand.vmem [shape: f32[1,32], index: 3, kind: input, shape index: {}]   ;;  %s1272_s4 = inlined_call_operand.vmem [shape: f32[16,32], index: 4, kind: output, shape index: {}]  }
   0x1 LB: > { %s931_s16 = sadd.s32 4294967295, %s1108_s15   ;;  %p935_p0 = scmp.ge.s32.totalorder %s1108_s15, 1  ;;  %s1108_s15 = sphi %s1148_s15, %s14_s15  }
   0x2   : > { %p170_p1 = scmp.lt.s32.totalorder %s1108_s15, 3 }
   0x4   : > { %p171_p2 = pnand %p935_p0, %p170_p1 }
   0x5   : > { %p198_p3 = scmp.lt.s32.totalorder (!%p171_p2), %s931_s16, 1  ;;  %v1110_v0 = vmov (!%p171_p2), 0.0   ;;  %vm1111_vm0 = vmmov (!%p171_p2), 0   ;;  %s1112_s21 = smov (!%p171_p2), 96   ;;  %vm230_vm1 = vcmask (!%p171_p2), 64512   ;;  %vm295_vm2 = vcmask (!%p171_p2), 1043456  }
   0x6   : > { %174 = sbr.rel (%p171_p2) target bundleno = 2185 (0x889), region = 36  ;;  %979 = vmatprep.subr.bf16.mxu0 (!%p171_p2), %v1110_v0  ;;  %981 = vmatprep.mubr.msk.bf16.mxu0 (!%p171_p2), %vm1111_vm0, %v1110_v0  ;;  %s1113_s22 = smov (!%p171_p2), 64   ;;  %v212_v28 = vld [vmem:[%s1270_s2] sm:$0xf] (!%p171_p2)  ;;  %vm864_vm3 = vcmask (!%p171_p2), 261120  }
   0x7   : > { %991 = vmatprep.subr.bf16.mxu1 (!%p171_p2), %v1110_v0  ;;  %993 = vmatprep.mubr.msk.bf16.mxu1 (!%p171_p2), %vm1111_vm0, %v1110_v0  ;;  %s1114_s23 = smov (!%p171_p2), 88   ;;  %s1115_s24 = smov (!%p171_p2), 120   ;;  %v344_v29 = vsel (!%p171_p2), %vm295_vm2, %v212_v28, 0 }
   0x8   : > { %s1116_s25 = smov (!%p171_p2), 80   ;;  %s1117_s26 = smov (!%p171_p2), 112   ;;  %992 = vmatpush3.bf16.msra.mxu1 (!%p171_p2), %v344_v29 }
   0x9   : > { %1003 = vmatprep.subr.bf16.mxu1 (!%p171_p2), %v1110_v0  ;;  %s1118_s29 = smov (!%p171_p2), 48   ;;  %s1119_s30 = smov (!%p171_p2), 72  }
   0xa   : > { %s1120_s5 = smov (!%p171_p2), 104   ;;  %s1121_s6 = smov (!%p171_p2), 56  }
   0xb   : > { %s1122_s11 = smov (!%p171_p2), 40  }
   0xd   : > { %s1274_s16 = smov (!%p198_p3, %s931_s16), 1 }
   0xe   : > { %s936_s17 = sshll.u32 %s1274_s16, 2  ;;  %s937_s14 = sshll.u32 %s1274_s16, 3 }
   0xf   : > { %s201_s20 = scalar_lea.vmem %s1268_s0, %s936_s17  ;;  %s205_s19 = scalar_lea.vmem %s1269_s1, %s937_s14 }
  0x10   : > { %v211_v1 = vld [vmem:[%s201_s20] sm:$0xf] }
  0x11   : > { %v1168_v2 = vcombine.low %v211_v1, %v211_v1 }
  0x13   : > { %228 = vrot.lane.b32.xlu0 %v1168_v2, %s1112_s21  ;;  %290 = vrot.lane.b32.xlu1 %v1168_v2, %s1113_s22 }
  0x17   : > { %389 = vrot.lane.b32.xlu1 %v1168_v2, %s1114_s23 }
  0x85   : > { %v229_v3 = vpop.permute.xlu0 %228  ;;  %v291_v11 = vpop.permute.xlu1 %290 }
  0x86   : > { %v235_v4 = vsel %vm230_vm1, %v229_v3, 0  ;;  %v297_v12 = vsel %vm295_vm2, %v291_v11, 0 }
  0x87   : > { %980 = vmatpush3.bf16.xpose.msra.mxu0 %v235_v4 }
  0x88   : > { %985 = vmatprep.subr.bf16.mxu0 %v1110_v0 }
  0x89   : > { %v390_v18 = vpop.permute.xlu1 %389 }
  0x8a   : > { %v395_v24 = vsel %vm230_vm1, %v390_v18, 0 }
  0x8e   : > { %982 = vmatmul.mubr.msk.bf16.vlgmr.msra.gmra.mrb[0].mxu0 %vm230_vm1, %v211_v1 }
  0x8f   : > { %987 = vmatprep.mubr.msk.bf16.mxu0 %vm1111_vm0, %v1110_v0  ;;  %986 = vmatpush3.bf16.msra.mxu0 %v297_v12 }
  0x90   : > { %997 = vmatprep.subr.bf16.mxu0 %v1110_v0 }
 0x161   : > { %v271_v5 = vpop.f32.mrb[0].mxu0 }
 0x162   : > { %v277_v6 = vmul.f32 0.35355338, %v271_v5  ;;  %v983_v7 = vpop.f32.mrb[1].mxu0 }
 0x163   : > { %v274_v8 = vpop.f32.mrb[2].mxu0 }
 0x164   : > { %v984_v9 = vpop.f32.mrb[3].mxu0  ;;  %v278_v10 = vsel %vm230_vm1, %v277_v6, -inf }
 0x165   : > { %279 = vmax.xlane.f32.xlu0 %v278_v10  ;;  %v213_v10 = vld [vmem:[%s1270_s2 + $0x4] sm:$0xf] }
 0x166   : > { %v503_v11 = vsel %vm295_vm2, %v213_v10, 0 }
 0x1f2   : > { %v280_v13 = vpop.xlane.xlu0 %279 }
 0x1f3   : > { %v281_v14 = vsub.f32 %v277_v6, %v280_v13 }
 0x1f5   : > { %v282_v15 = vmul.f32 1.442695, %v281_v14 }
 0x1f7   : > { %1086 = vpow2.f32 %v282_v15 }
 0x201   : > { %v1087_v16 = vpop.eup %1086 }
 0x202   : > { %v284_v17 = vsel %vm230_vm1, %v1087_v16, 0.0 }
 0x203   : > { %285 = vadd.xlane.f32.xlu1 %v284_v17 }
 0x214   : > { %387 = vrot.lane.b32.xlu1 %v1168_v2, %s1115_s24  ;;  %s209_s24 = scalar_lea.vmem %s1272_s4, %s937_s14 }
 0x218   : > { %548 = vrot.lane.b32.xlu1 %v1168_v2, %s1116_s25 }
 0x21c   : > { %546 = vrot.lane.b32.xlu1 %v1168_v2, %s1117_s26 }
 0x290   : > { %v286_v19 = vpop.xlane.xlu1 %285 }
 0x291   : > { %1088 = vrcp.f32 %v286_v19 }
 0x294   : > { %v388_v22 = vpop.permute.xlu1 %387 }
 0x298   : > { %v549_v25 = vpop.permute.xlu1 %548 }
 0x299   : > { %v554_v26 = vsel %vm230_vm1, %v549_v25, 0 }
 0x29b   : > { %v1089_v20 = vpop.eup %1088 }
 0x29c   : > { %v288_v21 = vmul.f32 %v1089_v20, %v1087_v16  ;;  %v547_v27 = vpop.permute.xlu1 %546 }
 0x29e   : > { %v289_v23 = vpack.c.bf16 %v288_v21, %v288_v21 }
 0x2a0   : > { %988 = vmatmul.mubr.msk.bf16.vlgmr.msra.gmra.mrb[4].mxu0 %vm230_vm1, %v289_v23 }
 0x2a1   : > { %998 = vmatpush3.bf16.xpose.msra.mxu0 %v395_v24  ;;  %999 = vmatprep.mubr.msk.bf16.mxu0 %vm1111_vm0, %v1110_v0 }
 0x2a2   : > { %1015 = vmatprep.subr.bf16.mxu0 %v1110_v0 }
 0x2a8   : > { %1000 = vmatmul.mubr.msk.bf16.vlgmr.msra.gmra.mrb[8].mxu0 %vm230_vm1, %v388_v22  ;;  %v214_v22 = vld [vmem:[%s1270_s2 + $0x8] sm:$0xf] }
 0x2a9   : > { %1016 = vmatpush3.bf16.xpose.msra.mxu0 %v554_v26  ;;  %1017 = vmatprep.mubr.msk.bf16.mxu0 %vm1111_vm0, %v1110_v0  ;;  %v662_v26 = vsel %vm295_vm2, %v214_v22, 0 }
 0x2aa   : > { %1021 = vmatprep.subr.bf16.mxu0 %v1110_v0 }
 0x2b0   : > { %1018 = vmatmul.mubr.msk.bf16.vlgmr.msra.gmra.mrb[12].mxu0 %vm230_vm1, %v547_v27 }
 0x2b1   : > { %1023 = vmatprep.mubr.msk.bf16.mxu0 %vm1111_vm0, %v1110_v0 }
 0x373   : > { %v333_v30 = vpop.f32.mrb[4].mxu0 }
 0x374   : > { %v339_v31 = vpack.c.bf16 %v333_v30, %v333_v30  ;;  %v989_v32 = vpop.f32.mrb[5].mxu0 }
 0x375   : > { %v336_v33 = vpop.f32.mrb[6].mxu0 }
 0x376   : > { %v990_v34 = vpop.f32.mrb[7].mxu0  ;;  %994 = vmatmul.mubr.msk.bf16.vlgmr.msra.gmra.mrb[0].mxu1 %vm230_vm1, %v339_v31 }
 0x377   : > { %1005 = vmatprep.mubr.msk.bf16.mxu1 %vm1111_vm0, %v1110_v0 }
 0x37b   : > { %v431_v35 = vpop.f32.mrb[8].mxu0 }
 0x37c   : > { %v1001_v36 = vpop.f32.mrb[9].mxu0  ;;  %v437_v45 = vmul.f32 0.35355338, %v431_v35 }
 0x37d   : > { %v434_v37 = vpop.f32.mrb[10].mxu0 }
 0x37e   : > { %v1002_v38 = vpop.f32.mrb[11].mxu0  ;;  %v438_v46 = vsel %vm230_vm1, %v437_v45, -inf }
 0x383   : > { %v590_v39 = vpop.f32.mrb[12].mxu0 }
 0x384   : > { %v596_v40 = vmul.f32 0.35355338, %v590_v39  ;;  %v1019_v41 = vpop.f32.mrb[13].mxu0  ;;  %v215_v39 = vld [vmem:[%s1270_s2 + $0xc] sm:$0xf] }
 0x385   : > { %v593_v42 = vpop.f32.mrb[14].mxu0 }
 0x386   : > { %v1020_v43 = vpop.f32.mrb[15].mxu0  ;;  %v597_v44 = vsel %vm230_vm1, %v596_v40, -inf  ;;  %v821_v42 = vsel %vm295_vm2, %v215_v39, 0 }
 0x387   : > { %598 = vmax.xlane.f32.xlu0 %v597_v44 }
 0x39d   : > { %609 = vrot.lane.b32.xlu0 %v1168_v2, %s1118_s29 }
 0x3a1   : > { %707 = vrot.lane.b32.xlu0 %v1168_v2, %s1119_s30 }
 0x3a5   : > { %705 = vrot.lane.b32.xlu0 %v1168_v2, %s1120_s5 }
 0x3c4   : > { %439 = vmax.xlane.f32.xlu0 %v438_v46 }
 0x414   : > { %v599_v47 = vpop.xlane.xlu0 %598 }
 0x415   : > { %v600_v48 = vsub.f32 %v596_v40, %v599_v47  ;;  %v216_v47 = vld [vmem:[%s205_s19] sm:$0xff] }
 0x417   : > { %v601_v49 = vmul.f32 1.442695, %v600_v48  ;;  %v939_v48 = vld [vmem:[%s1271_s3] ss:$0 sm:$0xff] }
 0x418   : > { %v610_v50 = vpop.permute.xlu0 %609 }
 0x419   : > { %1090 = vpow2.f32 %v601_v49  ;;  %v615_v51 = vsel %vm295_vm2, %v610_v50, 0  ;;  %v224_v49 = vadd.f32 %v939_v48, %v216_v47 }
 0x41a   : > { %1022 = vmatpush3.bf16.msra.mxu0 %v615_v51 }
 0x41b   : > { %1033 = vmatprep.subr.bf16.mxu0 %v1110_v0 }
 0x41c   : > { %v708_v54 = vpop.permute.xlu0 %707 }
 0x41d   : > { %v713_v1 = vsel %vm230_vm1, %v708_v54, 0 }
 0x420   : > { %v706_v55 = vpop.permute.xlu0 %705 }
 0x423   : > { %v1091_v52 = vpop.eup %1090 }
 0x424   : > { %v603_v53 = vsel %vm230_vm1, %v1091_v52, 0.0 }
 0x425   : > { %604 = vadd.xlane.f32.xlu1 %v603_v53 }
 0x451   : > { %v440_v56 = vpop.xlane.xlu0 %439 }
 0x452   : > { %v441_v57 = vsub.f32 %v437_v45, %v440_v56 }
 0x454   : > { %v442_v58 = vmul.f32 1.442695, %v441_v57 }
 0x456   : > { %1092 = vpow2.f32 %v442_v58 }
 0x460   : > { %v1093_v59 = vpop.eup %1092 }
 0x461   : > { %v444_v60 = vsel %vm230_vm1, %v1093_v59, 0.0 }
 0x462   : > { %445 = vadd.xlane.f32.xlu1 %v444_v60 }
 0x473   : > { %450 = vrot.lane.b32.xlu1 %v1168_v2, %s1121_s6 }
 0x4b2   : > { %v605_v61 = vpop.xlane.xlu1 %604 }
 0x4b3   : > { %1094 = vrcp.f32 %v605_v61 }
 0x4bd   : > { %v1095_v62 = vpop.eup %1094 }
 0x4be   : > { %v607_v63 = vmul.f32 %v1095_v62, %v1091_v52 }
 0x4c0   : > { %v608_v3 = vpack.c.bf16 %v607_v63, %v607_v63 }
 0x4c2   : > { %1024 = vmatmul.mubr.msk.bf16.vlgmr.msra.gmra.mrb[16].mxu0 %vm230_vm1, %v608_v3 }
 0x4c3   : > { %1034 = vmatpush3.bf16.xpose.msra.mxu0 %v713_v1  ;;  %1035 = vmatprep.mubr.msk.bf16.mxu0 %vm1111_vm0, %v1110_v0 }
 0x4ca   : > { %1036 = vmatmul.mubr.msk.bf16.vlgmr.msra.gmra.mrb[20].mxu0 %vm230_vm1, %v706_v55 }
 0x4ef   : > { %v446_v4 = vpop.xlane.xlu1 %445 }
 0x4f0   : > { %1096 = vrcp.f32 %v446_v4 }
 0x4f3   : > { %v451_v5 = vpop.permute.xlu1 %450 }
 0x4f4   : > { %v456_v6 = vsel %vm295_vm2, %v451_v5, 0 }
 0x4f5   : > { %1004 = vmatpush3.bf16.msra.mxu1 %v456_v6 }
 0x4f6   : > { %1009 = vmatprep.subr.bf16.mxu1 %v1110_v0 }
 0x4fa   : > { %v1097_v7 = vpop.eup %1096 }
 0x4fb   : > { %v448_v8 = vmul.f32 %v1097_v7, %v1093_v59 }
 0x4fd   : > { %v449_v9 = vpack.c.bf16 %v448_v8, %v448_v8 }
 0x4ff   : > { %1006 = vmatmul.mubr.msk.bf16.vlgmr.msra.gmra.mrb[4].mxu1 %vm230_vm1, %v449_v9 }
 0x500   : > { %1011 = vmatprep.mubr.msk.bf16.mxu1 %vm1111_vm0, %v1110_v0  ;;  %1010 = vmatpush3.bf16.msra.mxu1 %v503_v11 }
 0x501   : > { %1027 = vmatprep.subr.bf16.mxu1 %v1110_v0 }
 0x595   : > { %v651_v12 = vpop.f32.mrb[16].mxu0 }
 0x596   : > { %v1025_v13 = vpop.f32.mrb[17].mxu0  ;;  %v657_v29 = vpack.c.bf16 %v651_v12, %v651_v12 }
 0x597   : > { %v654_v14 = vpop.f32.mrb[18].mxu0 }
 0x598   : > { %v1026_v15 = vpop.f32.mrb[19].mxu0 }
 0x59d   : > { %v749_v16 = vpop.f32.mrb[20].mxu0 }
 0x59e   : > { %v755_v17 = vmul.f32 0.35355338, %v749_v16  ;;  %v1037_v18 = vpop.f32.mrb[21].mxu0 }
 0x59f   : > { %v752_v19 = vpop.f32.mrb[22].mxu0 }
 0x5a0   : > { %v1038_v20 = vpop.f32.mrb[23].mxu0  ;;  %v756_v21 = vsel %vm230_vm1, %v755_v17, -inf }
 0x5a1   : > { %757 = vmax.xlane.f32.xlu1 %v756_v21 }
 0x5d2   : > { %v492_v23 = vpop.f32.mrb[4].mxu1 }
 0x5d3   : > { %v498_v24 = vpack.c.bf16 %v492_v23, %v492_v23  ;;  %v1007_v25 = vpop.f32.mrb[5].mxu1 }
 0x5d4   : > { %v495_v27 = vpop.f32.mrb[6].mxu1 }
 0x5d5   : > { %v1008_v28 = vpop.f32.mrb[7].mxu1  ;;  %1012 = vmatmul.mubr.msk.bf16.vlgmr.msra.gmra.mrb[0].mxu1 %vm230_vm1, %v498_v24 }
 0x5d6   : > { %1028 = vmatpush3.bf16.msra.mxu1 %v662_v26  ;;  %1029 = vmatprep.mubr.msk.bf16.mxu1 %vm1111_vm0, %v1110_v0 }
 0x5d7   : > { %1039 = vmatprep.subr.bf16.mxu1 %v1110_v0 }
 0x5e1   : > { %1030 = vmatmul.mubr.msk.bf16.vlgmr.msra.gmra.mrb[0].mxu1 %vm230_vm1, %v657_v29 }
 0x5e2   : > { %1041 = vmatprep.mubr.msk.bf16.mxu1 %vm1111_vm0, %v1110_v0 }
 0x62e   : > { %v758_v30 = vpop.xlane.xlu1 %757 }
 0x62f   : > { %v759_v31 = vsub.f32 %v755_v17, %v758_v30 }
 0x631   : > { %v760_v32 = vmul.f32 1.442695, %v759_v31 }
 0x633   : > { %1098 = vpow2.f32 %v760_v32 }
 0x63d   : > { %v1099_v33 = vpop.eup %1098 }
 0x63e   : > { %v762_v34 = vsel %vm230_vm1, %v1099_v33, 0.0 }
 0x63f   : > { %763 = vadd.xlane.f32.xlu0 %v762_v34 }
 0x655   : > { %768 = vrot.lane.b32.xlu0 %v1168_v2, %s1122_s11 }
 0x6cc   : > { %v764_v35 = vpop.xlane.xlu0 %763 }
 0x6cd   : > { %1100 = vrcp.f32 %v764_v35 }
 0x6d0   : > { %v769_v36 = vpop.permute.xlu0 %768 }
 0x6d1   : > { %v774_v37 = vsel %vm295_vm2, %v769_v36, 0 }
 0x6d2   : > { %1040 = vmatpush3.bf16.msra.mxu1 %v774_v37 }
 0x6d3   : > { %1045 = vmatprep.subr.bf16.mxu1 %v1110_v0 }
 0x6d7   : > { %v1101_v38 = vpop.eup %1100 }
 0x6d8   : > { %v766_v40 = vmul.f32 %v1101_v38, %v1099_v33 }
 0x6da   : > { %v767_v41 = vpack.c.bf16 %v766_v40, %v766_v40 }
 0x6dc   : > { %1042 = vmatmul.mubr.msk.bf16.vlgmr.msra.gmra.mrb[8].mxu1 %vm230_vm1, %v767_v41 }
 0x6dd   : > { %1046 = vmatpush3.bf16.msra.mxu1 %v821_v42  ;;  %1047 = vmatprep.mubr.msk.bf16.mxu1 %vm1111_vm0, %v1110_v0 }
 0x7af   : > { %v810_v2 = vpop.f32.mrb[8].mxu1 }
 0x7b0   : > { %v816_v43 = vpack.c.bf16 %v810_v2, %v810_v2  ;;  %v1043_v44 = vpop.f32.mrb[9].mxu1 }
 0x7b1   : > { %v813_v45 = vpop.f32.mrb[10].mxu1 }
 0x7b2   : > { %v1044_v46 = vpop.f32.mrb[11].mxu1  ;;  %1048 = vmatmul.mubr.msk.bf16.vlgmr.msra.gmra.mrb[0].mxu1 %vm230_vm1, %v816_v43 }
 0x885   : > { %v857_v0 = vpop.f32.mrb[0].mxu1 }
 0x886   : > { %v1051_v50 = vadd.f32 %v857_v0, %v224_v49  ;;  %v1049_v51 = vpop.f32.mrb[1].mxu1 }
 0x887   : > { %v860_v52 = vpop.f32.mrb[2].mxu1 }
 0x888   : > { %865 = vst.msk [vmem:[%s209_s24] sm:$0xff] %vm864_vm3, %v1051_v50  ;;  %v1050_v53 = vpop.f32.mrb[3].mxu1 }
 0x889 PF: > { %s14_s15 = sadd.s32 1, %s1108_s15  }
 0x88a   : > { %p11_p4 = scmp.ge.s32.totalorder %s14_s15, 4  }
 0x88c   :  { %13 = sbr.rel (!%p11_p4) target bundleno = 1 (0x1), region = 69 }

// kernel: transformer_decoder_forward.10
= control target key start
LH: loop header
LB: loop body
LE: loop exit
PB: predicated region body
PF: predicated region fallthrough
CT: control target
= control target key end

     0   :  { %vm25_vm0 = vcmask 261120   ;;  %v181_v15 = vmov 0.0   ;;  %vm182_vm1 = vmmov 0   ;;  %vm145_vm2 = vcmask 781312   ;;  %s245_s0 = inlined_call_operand.vmem [shape: f32[16,32], index: 0, kind: input, shape index: {}]   ;;  %s246_s3 = inlined_call_operand.vmem [shape: bf16[32,96], index: 3, kind: input, shape index: {}]   ;;  %s247_s1 = inlined_call_operand.vmem [shape: f32[1,32], index: 1, kind: input, shape index: {}]   ;;  %s248_s2 = inlined_call_operand.vmem [shape: f32[1,32], index: 2, kind: input, shape index: {}]   ;;  %s249_s4 = inlined_call_operand.vmem [shape: f32[1,96], index: 4, kind: input, shape index: {}]   ;;  %s250_s5 = inlined_call_operand.vmem [shape: bf16[16,96], index: 5, kind: output, shape index: {}]  }
   0x1   :  { %v21_v0 = vld [vmem:[%s245_s0] sm:$0xff]  ;;  %v22_v1 = vld [vmem:[%s245_s0 + $0x8] sm:$0xff]  ;;  %165 = vmatprep.subr.bf16.mxu0 %v181_v15  ;;  %169 = vmatprep.mubr.msk.bf16.mxu0 %vm182_vm1, %v181_v15 }
   0x2   :  { %v26_v2 = vsel %vm25_vm0, %v21_v0, 0.0  ;;  %v29_v3 = vsel %vm25_vm0, %v22_v1, 0.0  ;;  %v175_v14 = vld [vmem:[%s246_s3] sm:$0xff]   ;;  %v176_v16 = vld [vmem:[%s246_s3 + $0x8] sm:$0xff]  }
   0x3   :  { %27 = vadd.xlane.f32.xlu0 %v26_v2  ;;  %166 = vmatpush3.bf16.msra.mxu0 %v175_v14  ;;  %v152_v25 = vld [vmem:[%s247_s1] ss:$0 sm:$0xff] }
   0x4   :  { %167 = vmatprep.subr.bf16.mxu0 %v181_v15  ;;  %v153_v29 = vld [vmem:[%s248_s2] ss:$0 sm:$0xff] }
   0x5   :  { %v154_v34 = vld [vmem:[%s249_s4] ss:$0 sm:$0xff] }
   0x7   :  { %30 = vadd.xlane.f32.xlu0 %v29_v3  ;;  %168 = vmatpush3.bf16.msra.mxu0 %v176_v16 }
  0x90   :  { %v28_v4 = vpop.xlane.xlu0 %27 }
  0x91   :  { %v33_v5 = vmul.f32 0.03125, %v28_v4 }
  0x93   :  { %v35_v6 = vsub.f32 %v21_v0, %v33_v5 }
  0x94   :  { %v31_v7 = vpop.xlane.xlu0 %30 }
  0x95   :  { %v34_v8 = vmul.f32 0.03125, %v31_v7  ;;  %v37_v9 = vmul.f32 %v35_v6, %v35_v6 }
  0x97   :  { %v36_v10 = vsub.f32 %v22_v1, %v34_v8  ;;  %v39_v11 = vsel %vm25_vm0, %v37_v9, 0.0 }
  0x98   :  { %40 = vadd.xlane.f32.xlu1 %v39_v11 }
  0x99   :  { %v38_v12 = vmul.f32 %v36_v10, %v36_v10 }
  0x9b   :  { %v42_v13 = vsel %vm25_vm0, %v38_v12, 0.0 }
  0x9c   :  { %43 = vadd.xlane.f32.xlu1 %v42_v13 }
 0x125   :  { %v41_v17 = vpop.xlane.xlu1 %40 }
 0x126   :  { %v45_v18 = vmul.f32 0.03125, %v41_v17 }
 0x128   :  { %v47_v19 = vadd.f32 1e-06, %v45_v18 }
 0x129   :  { %v44_v20 = vpop.xlane.xlu1 %43 }
 0x12a   :  { %177 = vrsqrt.f32 %v47_v19  ;;  %v46_v21 = vmul.f32 0.03125, %v44_v20 }
 0x12c   :  { %v48_v22 = vadd.f32 1e-06, %v46_v21 }
 0x12e   :  { %179 = vrsqrt.f32 %v48_v22 }
 0x134   :  { %v178_v23 = vpop.eup %177 }
 0x135   :  { %v51_v24 = vmul.f32 %v178_v23, %v35_v6 }
 0x137   :  { %v59_v28 = vmul.f32 %v152_v25, %v51_v24 }
 0x138   :  { %v180_v26 = vpop.eup %179 }
 0x139   :  { %v52_v27 = vmul.f32 %v180_v26, %v36_v10  ;;  %v67_v31 = vadd.f32 %v153_v29, %v59_v28 }
 0x13b   :  { %v60_v30 = vmul.f32 %v152_v25, %v52_v27 }
 0x13d   :  { %v68_v32 = vadd.f32 %v153_v29, %v60_v30 }
 0x13f   :  { %v69_v33 = vpack.c.bf16 %v68_v32, %v67_v31 }
 0x141   :  { %170 = vmatmul.mubr.msk.bf16.vlgmr.msra.gmra.mrb[0].mxu0 %vm25_vm0, %v69_v33 }
 0x214   :  { %v130_v35 = vpop.f32.mrb[0].mxu0 }
 0x215   :  { %v131_v36 = vadd.f32 %v154_v34, %v130_v35  ;;  %v171_v37 = vpop.f32.mrb[1].mxu0 }
 0x216   :  { %v133_v38 = vpop.f32.mrb[2].mxu0 }
 0x217   :  { %v160_v39 = vpack.c.bf16 %v131_v36, %v131_v36  ;;  %v134_v40 = vadd.f32 %v154_v34, %v133_v38  ;;  %v172_v41 = vpop.f32.mrb[3].mxu0 }
 0x219   :  { %146 = vst.msk [vmem:[%s250_s5] sm:$0xf] %vm145_vm2, %v160_v39  ;;  %v161_v42 = vpack.c.bf16 %v134_v40, %v134_v40 }
 0x21b   :  { %147 = vst.msk [vmem:[%s250_s5 + $0x4] sm:$0xf] %vm145_vm2, %v161_v42 }

// kernel: transformer_decoder_forward.13
= control target key start
LH: loop header
LB: loop body
LE: loop exit
PB: predicated region body
PF: predicated region fallthrough
CT: control target
= control target key end

     0   :  { %vm19_vm0 = vcmask 261120   ;;  %s167_s0 = inlined_call_operand.vmem [shape: f32[16,32], index: 0, kind: input, shape index: {}]   ;;  %s168_s1 = inlined_call_operand.vmem [shape: f32[1,32], index: 1, kind: input, shape index: {}]   ;;  %s169_s2 = inlined_call_operand.vmem [shape: f32[1,32], index: 2, kind: input, shape index: {}]   ;;  %s170_s3 = inlined_call_operand.hbm [shape: f32[16,32], index: 3, kind: output, shape index: {}]  }
   0x1   :  { %v15_v0 = vld [vmem:[%s167_s0] sm:$0xff]  ;;  %v16_v1 = vld [vmem:[%s167_s0 + $0x8] sm:$0xff] }
   0x2   :  { %8 = vsyncpa [#allocation3], 0  ;;  %v20_v2 = vsel %vm19_vm0, %v15_v0, 0.0  ;;  %v23_v3 = vsel %vm19_vm0, %v16_v1, 0.0  ;;  %v81_v21 = vld [vmem:[%s168_s1] ss:$0 sm:$0xff] }
   0x3   :  { %21 = vadd.xlane.f32.xlu0 %v20_v2  ;;  %v82_v23 = vld [vmem:[%s169_s2] ss:$0 sm:$0xff]  ;;  %s114_s19 = smov [#allocation2]  }
   0x4   :  { %s70_s20 = sshll.u32 %s114_s19, 4  ;;  %s71_s20 = int_to_ptr.vmem [resolvable:$true] %s70_s20 }
   0x5   :  { %s90_s21 = scalar_lea.vmem %s71_s20, 256  ;;  %p95_p1 = scmp.lt.s32.totalorder %s71_s20, %s71_s20 }
   0x6   :  { %p91_p0 = scmp.ne.s32.totalorder %s71_s20, %s90_s21  ;;  %p96_p2 = scmp.lt.s32.totalorder %s90_s21, %s90_s21 }
   0x7   :  { %24 = vadd.xlane.f32.xlu0 %v23_v3 }
   0x8   :  { %p97_p3 = por %p96_p2, %p95_p1 }
   0xa   :  { %p98_p4 = pnand %p97_p3, %p91_p0 }
  0x90   :  { %v22_v4 = vpop.xlane.xlu0 %21 }
  0x91   :  { %v27_v5 = vmul.f32 0.03125, %v22_v4 }
  0x93   :  { %v29_v6 = vsub.f32 %v15_v0, %v27_v5 }
  0x94   :  { %v25_v7 = vpop.xlane.xlu0 %24 }
  0x95   :  { %v28_v8 = vmul.f32 0.03125, %v25_v7  ;;  %v31_v9 = vmul.f32 %v29_v6, %v29_v6 }
  0x97   :  { %v30_v10 = vsub.f32 %v16_v1, %v28_v8  ;;  %v33_v11 = vsel %vm19_vm0, %v31_v9, 0.0 }
  0x98   :  { %34 = vadd.xlane.f32.xlu1 %v33_v11 }
  0x99   :  { %v32_v12 = vmul.f32 %v30_v10, %v30_v10 }
  0x9b   :  { %v36_v13 = vsel %vm19_vm0, %v32_v12, 0.0 }
  0x9c   :  { %37 = vadd.xlane.f32.xlu1 %v36_v13 }
 0x125   :  { %v35_v14 = vpop.xlane.xlu1 %34 }
 0x126   :  { %v39_v15 = vmul.f32 0.03125, %v35_v14 }
 0x128   :  { %v41_v16 = vadd.f32 1e-06, %v39_v15 }
 0x129   :  { %v38_v17 = vpop.xlane.xlu1 %37 }
 0x12a   :  { %86 = vrsqrt.f32 %v41_v16  ;;  %v40_v18 = vmul.f32 0.03125, %v38_v17 }
 0x12c   :  { %v42_v19 = vadd.f32 1e-06, %v40_v18 }
 0x12e   :  { %88 = vrsqrt.f32 %v42_v19 }
 0x134   :  { %v87_v20 = vpop.eup %86 }
 0x135   :  { %v45_v22 = vmul.f32 %v87_v20, %v29_v6 }
 0x137   :  { %v53_v24 = vmul.f32 %v81_v21, %v45_v22 }
 0x138   :  { %v89_v25 = vpop.eup %88 }
 0x139   :  { %v46_v26 = vmul.f32 %v89_v25, %v30_v10  ;;  %v61_v27 = vadd.f32 %v82_v23, %v53_v24 }
 0x13b   :  { %v54_v28 = vmul.f32 %v81_v21, %v46_v26  ;;  %63 = vst.msk [vmem:[#allocation2] sm:$0xff] %vm19_vm0, %v61_v27 }
 0x13d   :  { %v62_v29 = vadd.f32 %v82_v23, %v54_v28 }
 0x13f   :  { %64 = vst.msk [vmem:[#allocation2 + $0x8] sm:$0xff] %vm19_vm0, %v62_v29 }
 0x140   :  { %101 = shalt.err (!%p98_p4)
}
 0x141   :  { %s102_s22 = scalar_lea.hbm %s170_s3, 256 }
 0x142   :  { %p103_p5 = scmp.ne.s32.totalorder %s170_s3, %s102_s22  ;;  %p106_p6 = scmp.lt.u32.totalorder %s102_s22, %s170_s3 }
 0x144   :  { %p108_p7 = pnand %p106_p6, %p103_p5 }
 0x146   :  { %111 = shalt.err (!%p108_p7)
}
 0x147   :  { %s115_s27 = smov 128   ;;  %s116_s28 = smov 8  }
 0x148   :  { %76 = dma.vmem_to_hbm [thread:$0]  %s71_s20, 256, %s170_s3, [#allocation3], %s115_s27, %s115_s27, %s116_s28  }
 0x149   :  { %112 = dma.done.wait [#allocation3], 256  }
 0x14a   :  { %113 = vsyncadd [#allocation3], 4294967040 }
 0x14b   :  { %80 = vsyncpa [#allocation3], 1 }

</bundles_post_ra>
